<compile_context>
chip_gen: v5e
topology: v5e:2x2
jax: 0.10.0
libtpu: 0.0.40
codegen_flags: <defaults>
</compile_context>

<pallas_src>
import functools

import jax
import jax.numpy as jnp
from jax.experimental import pallas as pl
from jax.experimental.pallas import tpu as pltpu


# Largest spatial tile (lanes).  f32: in 8 MiB + out 8 MiB (sublane-padded),
# double buffered ~= 32 MiB -> sized explicitly via vmem_limit_bytes below.
_MAX_TILE_S = 262144

# Heads with S below this are a single partially-filled block; launch cost
# dominates, so they go to plain einsum (review item: tiny-head handling).
_MIN_PALLAS_S = 8192


def _make_conv1x1_kernel(compute_dtype):
    def kernel(x_ref, w_ref, o_ref):
        # x_ref: (1, C, tile_s), w_ref: (K, C), o_ref: (1, K, tile_s)
        w = w_ref[...]
        x = x_ref[0]
        if compute_dtype is not None:
            w = w.astype(compute_dtype)
            x = x.astype(compute_dtype)
        o_ref[0] = jnp.dot(
            w, x, preferred_element_type=jnp.float32
        ).astype(o_ref.dtype)

    return kernel


def _pick_tile_s(S, max_tile_s):
    if S <= max_tile_s:
        return S            # single block (block dim == full array dim is legal)
    return max_tile_s       # multiple of 128; ragged last tile is clipped by Pallas


@functools.partial(jax.jit, static_argnames=("max_tile_s", "compute_dtype"))
def conv3d_1x1_pallas(x, w, *, max_tile_s=_MAX_TILE_S, compute_dtype=None):
    """x: (B, C, D, H, W); w: (K, C) -> (B, K, D, H, W).  No bias.  Pure Pallas."""
    B, C, D, H, W = x.shape
    K = w.shape[0]
    S = D * H * W
    xr = x.reshape(B, C, S)  # free reshape for NCDHW-contiguous x
    tile_s = _pick_tile_s(S, max_tile_s)
    grid = (B, pl.cdiv(S, tile_s))

    itemsize = jnp.dtype(x.dtype).itemsize
    # Per-step VMEM: input block + sublane-padded output block, double-buffered,
    # plus headroom for the resident weight / internal scratch.
    in_block = C * tile_s * itemsize
    out_block = max(K, 8) * tile_s * itemsize
    vmem_bytes = 2 * (in_block + out_block) + (4 << 20)

    cost = pl.CostEstimate(
        flops=2 * B * K * C * S,
        transcendentals=0,
        bytes_accessed=B * S * (C + K) * itemsize + K * C * jnp.dtype(w.dtype).itemsize,
    )

    out = pl.pallas_call(
        _make_conv1x1_kernel(compute_dtype),
        out_shape=jax.ShapeDtypeStruct((B, K, S), x.dtype),
        grid=grid,
        in_specs=[
            pl.BlockSpec((1, C, tile_s), lambda b, j: (b, 0, j)),
            pl.BlockSpec((K, C), lambda b, j: (0, 0)),   # resident weight
        ],
        out_specs=pl.BlockSpec((1, K, tile_s), lambda b, j: (b, 0, j)),
        compiler_params=pltpu.CompilerParams(
            dimension_semantics=("parallel", "parallel"),
            vmem_limit_bytes=int(vmem_bytes),
        ),
        cost_estimate=cost,
    )(xr, w)

    return out.reshape(B, K, D, H, W)


def conv3d_1x1(x, w):
    """Dispatch: tiny heads -> einsum (launch cost dominates), big -> Pallas."""
    _, _, D, H, W = x.shape
    S = D * H * W
    if S < _MIN_PALLAS_S:
        return jnp.einsum("bcdhw,kc->bkdhw", x, w)
    return conv3d_1x1_pallas(x, w)


def pred_headers_forward(params, x_32, x_64, x_128, x_256):
    """Mirrors PredHeaders.forward: returns (x_32, x_64, x_128, x_256)."""
    # TODO(synk): the four heads could be fused into a single pallas_call via
    # scalar-prefetched per-tile head ids over HBM refs; at production sizes
    # only the 256^3 head has meaningful wall time, so four calls (with the
    # tiny heads routed to einsum) keep the lane-dense path simple and robust.
    y_256 = conv3d_1x1(x_256, params["w_256"])
    y_128 = conv3d_1x1(x_128, params["w_128"])
    y_64 = conv3d_1x1(x_64, params["w_64"])
    y_32 = conv3d_1x1(x_32, params["w_32"])
    return (y_32, y_64, y_128, y_256)


def _ref_conv3d_1x1(x, w):
    # pure-JAX reference: out[b,k,d,h,w] = sum_c w[k,c] * x[b,c,d,h,w]
    return jnp.einsum("bcdhw,kc->bkdhw", x, w)


if __name__ == "__main__":
    geo_feat_channels = 8
    num_class = 4
    B = 2

    key = jax.random.PRNGKey(0)
    (k_x32, k_x64, k_x128, k_x256,
     k_w32, k_w64, k_w128, k_w256, k_rag) = jax.random.split(key, 9)

    # small multi-scale spatial shapes consistent with the head naming
    x_32 = jax.random.normal(k_x32, (B, geo_feat_channels, 4, 4, 4), jnp.float32)
    x_64 = jax.random.normal(k_x64, (B, geo_feat_channels, 8, 8, 8), jnp.float32)
    x_128 = jax.random.normal(k_x128, (B, geo_feat_channels, 16, 16, 16), jnp.float32)
    x_256 = jax.random.normal(k_x256, (B, geo_feat_channels, 32, 32, 32), jnp.float32)

    # Conv3d(geo_feat_channels, num_class, k=1, bias=False) weights, stored (K, C)
    params = {
        "w_32": 0.1 * jax.random.normal(k_w32, (num_class, geo_feat_channels), jnp.float32),
        "w_64": 0.1 * jax.random.normal(k_w64, (num_class, geo_feat_channels), jnp.float32),
        "w_128": 0.1 * jax.random.normal(k_w128, (num_class, geo_feat_channels), jnp.float32),
        "w_256": 0.1 * jax.random.normal(k_w256, (num_class, geo_feat_channels), jnp.float32),
    }

    outs = pred_headers_forward(params, x_32, x_64, x_128, x_256)
    outs = jax.block_until_ready(outs)

    refs = (
        _ref_conv3d_1x1(x_32, params["w_32"]),
        _ref_conv3d_1x1(x_64, params["w_64"]),
        _ref_conv3d_1x1(x_128, params["w_128"]),
        _ref_conv3d_1x1(x_256, params["w_256"]),
    )

    ok = True
    for o, r in zip(outs, refs):
        ok = ok and (o.shape == r.shape) and bool(jnp.allclose(o, r, atol=1e-5, rtol=1e-5))

    # Extra check: multi-tile grid with a ragged last tile (S % tile_s != 0),
    # exercising the cdiv / clipped-writeback path the big-head config relies on.
    x_rag = jax.random.normal(k_rag, (1, geo_feat_channels, 4, 10, 16), jnp.float32)  # S = 640
    y_rag = conv3d_1x1_pallas(x_rag, params["w_256"], max_tile_s=256)  # grid (1, 3), ragged last
    y_rag = jax.block_until_ready(y_rag)
    r_rag = _ref_conv3d_1x1(x_rag, params["w_256"])
    ok = ok and (y_rag.shape == r_rag.shape) and bool(jnp.allclose(y_rag, r_rag, atol=1e-5, rtol=1e-5))

    if ok:
        print("KERNEL_OK")
    else:
        print("KERNEL_MISMATCH")
</pallas_src>

<mosaic_0001>
module attributes {stable_mosaic.version = 11 : i64} {
  func.func @kernel(%arg0: i32, %arg1: i32, %arg2: memref<1x8x32768xf32, #tpu.memory_space<vmem>>, %arg3: memref<4x8xf32, #tpu.memory_space<vmem>>, %arg4: memref<1x4x32768xf32, #tpu.memory_space<vmem>>) attributes {dimension_semantics = [#tpu.dimension_semantics<parallel>, #tpu.dimension_semantics<parallel>], iteration_bounds = array<i64: 2, 1>, scalar_prefetch = 0 : i64, scratch_operands = 0 : i64, tpu.core_type = #tpu.core_type<tc>, window_params = [{transform_indices = @transform_0, window_bounds = array<i64: 1, 8, 32768>}, {pipeline_mode = #tpu.pipeline_mode<synchronous>, transform_indices = @transform_1, window_bounds = array<i64: 4, 8>}, {transform_indices = @transform_2, window_bounds = array<i64: 1, 4, 32768>}]} {
    %c0 = arith.constant 0 : index
    %c0_0 = arith.constant 0 : index
    %0 = vector.load %arg3[%c0, %c0_0] : memref<4x8xf32, #tpu.memory_space<vmem>>, vector<4x8xf32>
    %c0_1 = arith.constant 0 : index
    %c0_2 = arith.constant 0 : index
    %c0_3 = arith.constant 0 : index
    %1 = vector.load %arg2[%c0_1, %c0_2, %c0_3] : memref<1x8x32768xf32, #tpu.memory_space<vmem>>, vector<1x8x32768xf32>
    %2 = vector.shape_cast %1 : vector<1x8x32768xf32> to vector<8x32768xf32>
    %cst = arith.constant dense<0.000000e+00> : vector<4x32768xf32>
    %3 = tpu.matmul %0, %2, %cst {dimension_numbers = #tpu.dot_dimension_numbers<[1], [0], [0], [1], [0, 0, 1, 1], [], []>} : vector<4x8xf32>, vector<8x32768xf32>, vector<4x32768xf32> -> vector<4x32768xf32>
    %c0_4 = arith.constant 0 : index
    %c0_5 = arith.constant 0 : index
    %c0_6 = arith.constant 0 : index
    %4 = vector.load %arg4[%c0_4, %c0_5, %c0_6] : memref<1x4x32768xf32, #tpu.memory_space<vmem>>, vector<1x4x32768xf32>
    %5 = vector.shape_cast %4 : vector<1x4x32768xf32> to vector<4x32768xf32>
    %6 = vector.shape_cast %3 : vector<4x32768xf32> to vector<1x4x32768xf32>
    tpu.vector_store %arg4[%c0_4, %c0_5, %c0_6], %6 {strides = array<i32>} : memref<1x4x32768xf32, #tpu.memory_space<vmem>>, vector<1x4x32768xf32>,
    return
  }
  func.func @transform_0(%arg0: i32, %arg1: i32) -> (i32, i32, i32) {
    %c0_i32 = arith.constant 0 : i32
    %c0_i32_0 = arith.constant 0 : i32
    return %arg0, %c0_i32, %arg1 : i32, i32, i32
  }
  func.func @transform_1(%arg0: i32, %arg1: i32) -> (i32, i32) {
    %c0_i32 = arith.constant 0 : i32
    %c0_i32_0 = arith.constant 0 : i32
    %c0_i32_1 = arith.constant 0 : i32
    return %c0_i32, %c0_i32_0 : i32, i32
  }
  func.func @transform_2(%arg0: i32, %arg1: i32) -> (i32, i32, i32) {
    %c0_i32 = arith.constant 0 : i32
    %c0_i32_0 = arith.constant 0 : i32
    return %arg0, %c0_i32, %arg1 : i32, i32, i32
  }
}

</mosaic_0001>

<bundles_post_ra>
// kernel: conv3d_1x1_pallas.1
= control target key start
LH: loop header
LB: loop body
LE: loop exit
PB: predicated region body
PF: predicated region fallthrough
CT: control target
= control target key end

     0   :  { %s6754_s9 = smov 0   ;;  %s6756_s10 = smov 0   ;;  %s7834_s0 = inlined_call_operand.vmem [shape: f32[2,8,32768], index: 0, kind: input, shape index: {}]   ;;  %s7835_s1 = inlined_call_operand.vmem [shape: f32[4,8], index: 1, kind: input, shape index: {}]   ;;  %s7836_s2 = inlined_call_operand.vmem [shape: f32[2,4,32768], index: 2, kind: output, shape index: {}]  }
   0x1   :  { %s6758_s11 = smov 0  }
   0x2 LB: > { %s24_s12 = sadd.s32 1, %s6733_s10  ;;  %p6424_p0 = scmp.ge.s32.totalorder %s6737_s11, 1  ;;  %s6737_s11 = sphi %s6758_s11, %s12_s11   ;;  %s6733_s10 = sphi %s6756_s10, %s7838_s10   ;;  %s6729_s9 = sphi %s6754_s9, %s7837_s9  }
   0x3   : > { %p26_p1 = scmp.ge.s32.totalorder %s24_s12, 2  ;;  %p133_p2 = scmp.lt.s32.totalorder %s6737_s11, 3 }
   0x5   : > { %s7840_s12 = smov (%p26_p1, %s24_s12), 0  ;;  %p134_p3 = pnand %p6424_p0, %p133_p2 }
   0x6   : > { %p164_p4 = scmp.lt.s32.totalorder (!%p134_p3), %s6729_s9, 1 }
   0x7   : > { %137 = sbr.rel (%p134_p3) target bundleno = 657 (0x291), region = 28 }
   0xc   : > { %s7842_s9 = smov (!%p164_p4, %s6729_s9), 1  ;;  %v6783_v0 = vld [vmem:[%s7835_s1] sm:$0xf]  ;;  %vm440_vm0 = vcmask 64512   ;;  %vm5948_vm1 = vcmask 1043456  }
   0xd   : > { %s6687_s13 = sshll.u32 %s7842_s9, 11  ;;  %s6688_s19 = sshll.u32 %s7842_s9, 10 }
   0xe   : > { %s6778_s16 = scalar_lea.vmem %s7834_s0, %s6687_s13  ;;  %s6995_s22 = scalar_lea.vmem %s7836_s2, %s6688_s19 }
   0xf   : > { %v187_v1 = vld [vmem:[%s6778_s16 + $0x18] sm:$0xff]  ;;  %v186_v3 = vld [vmem:[%s6778_s16 + $0x10] sm:$0xff]  ;;  %v185_v5 = vld [vmem:[%s6778_s16 + $0x8] sm:$0xff] }
  0x10   : > { %v191_v2 = vld [vmem:[%s6778_s16 + $0x38] sm:$0xff]  ;;  %519 = vmatpush.msra.mxu3 %v187_v1  ;;  %499 = vmatpush.msra.mxu2 %v186_v3  ;;  %v190_v4 = vld [vmem:[%s6778_s16 + $0x30] sm:$0xff]  ;;  %v184_v6 = vld [vmem:[%s6778_s16] sm:$0xff] }
  0x11   : > { %6432 = vmatmul.msk.f32.vlgmr.msra.gmra.mxu3 %vm440_vm0, %v6783_v0  ;;  %6431 = vmatmul.msk.f32.vlgmr.msra.gmra.mxu2 %vm440_vm0, %v6783_v0  ;;  %v189_v7 = vld [vmem:[%s6778_s16 + $0x28] sm:$0xff]  ;;  %v188_v8 = vld [vmem:[%s6778_s16 + $0x20] sm:$0xff]  ;;  %v195_v9 = vld [vmem:[%s6778_s16 + $0x58] sm:$0xff] }
  0x12   : > { %599 = vmatpush.msrb.mxu3 %v191_v2  ;;  %579 = vmatpush.msrb.mxu2 %v190_v4  ;;  %v194_v10 = vld [vmem:[%s6778_s16 + $0x50] sm:$0xff]  ;;  %v193_v11 = vld [vmem:[%s6778_s16 + $0x48] sm:$0xff]  ;;  %v192_v12 = vld [vmem:[%s6778_s16 + $0x40] sm:$0xff] }
  0x13   : > { %479 = vmatpush.msra.mxu1 %v185_v5  ;;  %459 = vmatpush.msra.mxu0 %v184_v6  ;;  %v199_v13 = vld [vmem:[%s6778_s16 + $0x78] sm:$0xff]  ;;  %v198_v14 = vld [vmem:[%s6778_s16 + $0x70] sm:$0xff]  ;;  %v197_v15 = vld [vmem:[%s6778_s16 + $0x68] sm:$0xff] }
  0x14   : > { %6430 = vmatmul.msk.f32.vlgmr.msra.gmra.mxu1 %vm440_vm0, %v6783_v0  ;;  %6429 = vmatmul.msk.f32.vlgmr.msra.gmra.mxu0 %vm440_vm0, %v6783_v0  ;;  %v196_v16 = vld [vmem:[%s6778_s16 + $0x60] sm:$0xff]  ;;  %v203_v17 = vld [vmem:[%s6778_s16 + $0x98] sm:$0xff]  ;;  %v202_v18 = vld [vmem:[%s6778_s16 + $0x90] sm:$0xff] }
  0x15   : > { %559 = vmatpush.msrb.mxu1 %v189_v7  ;;  %539 = vmatpush.msrb.mxu0 %v188_v8  ;;  %v201_v19 = vld [vmem:[%s6778_s16 + $0x88] sm:$0xff]  ;;  %v200_v20 = vld [vmem:[%s6778_s16 + $0x80] sm:$0xff]  ;;  %v207_v21 = vld [vmem:[%s6778_s16 + $0xb8] sm:$0xff] }
  0x16   : > { %679 = vmatpush.msra.mxu3 %v195_v9  ;;  %659 = vmatpush.msra.mxu2 %v194_v10  ;;  %v206_v22 = vld [vmem:[%s6778_s16 + $0xb0] sm:$0xff]  ;;  %v205_v23 = vld [vmem:[%s6778_s16 + $0xa8] sm:$0xff]  ;;  %v204_v24 = vld [vmem:[%s6778_s16 + $0xa0] sm:$0xff] }
  0x17   : > { %639 = vmatpush.msra.mxu1 %v193_v11  ;;  %619 = vmatpush.msra.mxu0 %v192_v12  ;;  %v211_v25 = vld [vmem:[%s6778_s16 + $0xd8] sm:$0xff]  ;;  %v210_v26 = vld [vmem:[%s6778_s16 + $0xd0] sm:$0xff]  ;;  %v209_v27 = vld [vmem:[%s6778_s16 + $0xc8] sm:$0xff] }
  0x18   : > { %v208_v28 = vld [vmem:[%s6778_s16 + $0xc0] sm:$0xff]  ;;  %v215_v29 = vld [vmem:[%s6778_s16 + $0xf8] sm:$0xff]  ;;  %v214_v30 = vld [vmem:[%s6778_s16 + $0xf0] sm:$0xff] }
  0x19   : > { %6436 = vmatmul.msk.f32.vlgmr.msrb.gmra.mxu3 %vm440_vm0, %v6783_v0  ;;  %6435 = vmatmul.msk.f32.vlgmr.msrb.gmra.mxu2 %vm440_vm0, %v6783_v0  ;;  %v213_v31 = vld [vmem:[%s6778_s16 + $0xe8] sm:$0xff]  ;;  %v212_v32 = vld [vmem:[%s6778_s16 + $0xe0] sm:$0xff]  ;;  %v219_v33 = vld [vmem:[%s6778_s16 + $0x118] sm:$0xff] }
  0x1a   : > { %759 = vmatpush.msrb.mxu3 %v199_v13  ;;  %739 = vmatpush.msrb.mxu2 %v198_v14  ;;  %v218_v34 = vld [vmem:[%s6778_s16 + $0x110] sm:$0xff]  ;;  %v217_v35 = vld [vmem:[%s6778_s16 + $0x108] sm:$0xff]  ;;  %v216_v36 = vld [vmem:[%s6778_s16 + $0x100] sm:$0xff] }
  0x1b   : > { %v223_v37 = vld [vmem:[%s6778_s16 + $0x138] sm:$0xff]  ;;  %v222_v38 = vld [vmem:[%s6778_s16 + $0x130] sm:$0xff]  ;;  %v221_v39 = vld [vmem:[%s6778_s16 + $0x128] sm:$0xff] }
  0x1c   : > { %6434 = vmatmul.msk.f32.vlgmr.msrb.gmra.mxu1 %vm440_vm0, %v6783_v0  ;;  %6433 = vmatmul.msk.f32.vlgmr.msrb.gmra.mxu0 %vm440_vm0, %v6783_v0  ;;  %v220_v40 = vld [vmem:[%s6778_s16 + $0x120] sm:$0xff]  ;;  %v227_v41 = vld [vmem:[%s6778_s16 + $0x158] sm:$0xff]  ;;  %v226_v42 = vld [vmem:[%s6778_s16 + $0x150] sm:$0xff] }
  0x1d   : > { %719 = vmatpush.msrb.mxu1 %v197_v15  ;;  %699 = vmatpush.msrb.mxu0 %v196_v16  ;;  %v225_v43 = vld [vmem:[%s6778_s16 + $0x148] sm:$0xff]  ;;  %v224_v44 = vld [vmem:[%s6778_s16 + $0x140] sm:$0xff]  ;;  %v231_v45 = vld [vmem:[%s6778_s16 + $0x178] sm:$0xff] }
  0x1e   : > { %v230_v46 = vld [vmem:[%s6778_s16 + $0x170] sm:$0xff]  ;;  %v229_v47 = vld [vmem:[%s6778_s16 + $0x168] sm:$0xff]  ;;  %v228_v48 = vld [vmem:[%s6778_s16 + $0x160] sm:$0xff] }
  0x1f   : > { %v235_v49 = vld [vmem:[%s6778_s16 + $0x198] sm:$0xff]  ;;  %v234_v50 = vld [vmem:[%s6778_s16 + $0x190] sm:$0xff]  ;;  %v233_v51 = vld [vmem:[%s6778_s16 + $0x188] sm:$0xff] }
  0x20   : > { %v232_v52 = vld [vmem:[%s6778_s16 + $0x180] sm:$0xff]  ;;  %v239_v53 = vld [vmem:[%s6778_s16 + $0x1b8] sm:$0xff]  ;;  %v238_v54 = vld [vmem:[%s6778_s16 + $0x1b0] sm:$0xff] }
  0x21   : > { %6440 = vmatmul.msk.f32.vlgmr.msra.gmra.mxu3 %vm440_vm0, %v6783_v0  ;;  %6439 = vmatmul.msk.f32.vlgmr.msra.gmra.mxu2 %vm440_vm0, %v6783_v0  ;;  %v237_v55 = vld [vmem:[%s6778_s16 + $0x1a8] sm:$0xff]  ;;  %v236_v56 = vld [vmem:[%s6778_s16 + $0x1a0] sm:$0xff]  ;;  %v243_v57 = vld [vmem:[%s6778_s16 + $0x1d8] sm:$0xff] }
  0x22   : > { %839 = vmatpush.msra.mxu3 %v203_v17  ;;  %819 = vmatpush.msra.mxu2 %v202_v18  ;;  %v242_v58 = vld [vmem:[%s6778_s16 + $0x1d0] sm:$0xff]  ;;  %v241_v59 = vld [vmem:[%s6778_s16 + $0x1c8] sm:$0xff]  ;;  %v240_v60 = vld [vmem:[%s6778_s16 + $0x1c0] sm:$0xff] }
  0x23   : > { %v247_v61 = vld [vmem:[%s6778_s16 + $0x1f8] sm:$0xff]  ;;  %v246_v62 = vld [vmem:[%s6778_s16 + $0x1f0] sm:$0xff]  ;;  %v245_v63 = vld [vmem:[%s6778_s16 + $0x1e8] sm:$0xff] }
  0x24   : > { %6438 = vmatmul.msk.f32.vlgmr.msra.gmra.mxu1 %vm440_vm0, %v6783_v0  ;;  %6437 = vmatmul.msk.f32.vlgmr.msra.gmra.mxu0 %vm440_vm0, %v6783_v0  ;;  %v244_v1 = vld [vmem:[%s6778_s16 + $0x1e0] sm:$0xff]  ;;  %v251_v2 = vld [vmem:[%s6778_s16 + $0x218] sm:$0xff]  ;;  %v250_v3 = vld [vmem:[%s6778_s16 + $0x210] sm:$0xff] }
  0x25   : > { %799 = vmatpush.msra.mxu1 %v201_v19  ;;  %779 = vmatpush.msra.mxu0 %v200_v20  ;;  %v249_v4 = vld [vmem:[%s6778_s16 + $0x208] sm:$0xff]  ;;  %v248_v5 = vld [vmem:[%s6778_s16 + $0x200] sm:$0xff]  ;;  %v255_v6 = vld [vmem:[%s6778_s16 + $0x238] sm:$0xff] }
  0x26   : > { %v254_v7 = vld [vmem:[%s6778_s16 + $0x230] sm:$0xff]  ;;  %v253_v8 = vld [vmem:[%s6778_s16 + $0x228] sm:$0xff]  ;;  %v252_v9 = vld [vmem:[%s6778_s16 + $0x220] sm:$0xff] }
  0x27   : > { %v259_v10 = vld [vmem:[%s6778_s16 + $0x258] sm:$0xff]  ;;  %v258_v11 = vld [vmem:[%s6778_s16 + $0x250] sm:$0xff]  ;;  %v257_v15 = vld [vmem:[%s6778_s16 + $0x248] sm:$0xff] }
  0x28   : > { %v256_v16 = vld [vmem:[%s6778_s16 + $0x240] sm:$0xff] }
  0x29   : > { %6444 = vmatmul.msk.f32.vlgmr.msrb.gmra.mxu3 %vm440_vm0, %v6783_v0  ;;  %6443 = vmatmul.msk.f32.vlgmr.msrb.gmra.mxu2 %vm440_vm0, %v6783_v0 }
  0x2a   : > { %919 = vmatpush.msrb.mxu3 %v207_v21  ;;  %899 = vmatpush.msrb.mxu2 %v206_v22  ;;  %v263_v22 = vld [vmem:[%s6778_s16 + $0x278] sm:$0xff] }
  0x2c   : > { %6442 = vmatmul.msk.f32.vlgmr.msrb.gmra.mxu1 %vm440_vm0, %v6783_v0  ;;  %6441 = vmatmul.msk.f32.vlgmr.msrb.gmra.mxu0 %vm440_vm0, %v6783_v0 }
  0x2d   : > { %879 = vmatpush.msrb.mxu1 %v205_v23  ;;  %859 = vmatpush.msrb.mxu0 %v204_v24  ;;  %v262_v23 = vld [vmem:[%s6778_s16 + $0x270] sm:$0xff] }
  0x31   : > { %6448 = vmatmul.msk.f32.vlgmr.msra.gmra.mxu3 %vm440_vm0, %v6783_v0  ;;  %6447 = vmatmul.msk.f32.vlgmr.msra.gmra.mxu2 %vm440_vm0, %v6783_v0 }
  0x32   : > { %999 = vmatpush.msra.mxu3 %v211_v25  ;;  %979 = vmatpush.msra.mxu2 %v210_v26 }
  0x34   : > { %6446 = vmatmul.msk.f32.vlgmr.msra.gmra.mxu1 %vm440_vm0, %v6783_v0  ;;  %6445 = vmatmul.msk.f32.vlgmr.msra.gmra.mxu0 %vm440_vm0, %v6783_v0 }
  0x35   : > { %959 = vmatpush.msra.mxu1 %v209_v27  ;;  %939 = vmatpush.msra.mxu0 %v208_v28  ;;  %v261_v27 = vld [vmem:[%s6778_s16 + $0x268] sm:$0xff]  ;;  %v260_v28 = vld [vmem:[%s6778_s16 + $0x260] sm:$0xff] }
  0x39   : > { %6452 = vmatmul.msk.f32.vlgmr.msrb.gmra.mxu3 %vm440_vm0, %v6783_v0  ;;  %6451 = vmatmul.msk.f32.vlgmr.msrb.gmra.mxu2 %vm440_vm0, %v6783_v0 }
  0x3a   : > { %1079 = vmatpush.msrb.mxu3 %v215_v29  ;;  %1059 = vmatpush.msrb.mxu2 %v214_v30 }
  0x3c   : > { %6450 = vmatmul.msk.f32.vlgmr.msrb.gmra.mxu1 %vm440_vm0, %v6783_v0  ;;  %6449 = vmatmul.msk.f32.vlgmr.msrb.gmra.mxu0 %vm440_vm0, %v6783_v0 }
  0x3d   : > { %1039 = vmatpush.msrb.mxu1 %v213_v31  ;;  %1019 = vmatpush.msrb.mxu0 %v212_v32 }
  0x41   : > { %6456 = vmatmul.msk.f32.vlgmr.msra.gmra.mxu3 %vm440_vm0, %v6783_v0  ;;  %6455 = vmatmul.msk.f32.vlgmr.msra.gmra.mxu2 %vm440_vm0, %v6783_v0 }
  0x42   : > { %1159 = vmatpush.msra.mxu3 %v219_v33  ;;  %1139 = vmatpush.msra.mxu2 %v218_v34  ;;  %v267_v34 = vld [vmem:[%s6778_s16 + $0x298] sm:$0xff] }
  0x44   : > { %6454 = vmatmul.msk.f32.vlgmr.msra.gmra.mxu1 %vm440_vm0, %v6783_v0  ;;  %6453 = vmatmul.msk.f32.vlgmr.msra.gmra.mxu0 %vm440_vm0, %v6783_v0 }
  0x45   : > { %1119 = vmatpush.msra.mxu1 %v217_v35  ;;  %1099 = vmatpush.msra.mxu0 %v216_v36  ;;  %v266_v35 = vld [vmem:[%s6778_s16 + $0x290] sm:$0xff] }
  0x49   : > { %6460 = vmatmul.msk.f32.vlgmr.msrb.gmra.mxu3 %vm440_vm0, %v6783_v0  ;;  %6459 = vmatmul.msk.f32.vlgmr.msrb.gmra.mxu2 %vm440_vm0, %v6783_v0 }
  0x4a   : > { %1239 = vmatpush.msrb.mxu3 %v223_v37  ;;  %1219 = vmatpush.msrb.mxu2 %v222_v38 }
  0x4c   : > { %6458 = vmatmul.msk.f32.vlgmr.msrb.gmra.mxu1 %vm440_vm0, %v6783_v0  ;;  %6457 = vmatmul.msk.f32.vlgmr.msrb.gmra.mxu0 %vm440_vm0, %v6783_v0 }
  0x4d   : > { %1199 = vmatpush.msrb.mxu1 %v221_v39  ;;  %1179 = vmatpush.msrb.mxu0 %v220_v40  ;;  %v265_v39 = vld [vmem:[%s6778_s16 + $0x288] sm:$0xff]  ;;  %v264_v40 = vld [vmem:[%s6778_s16 + $0x280] sm:$0xff] }
  0x51   : > { %6464 = vmatmul.msk.f32.vlgmr.msra.gmra.mxu3 %vm440_vm0, %v6783_v0  ;;  %6463 = vmatmul.msk.f32.vlgmr.msra.gmra.mxu2 %vm440_vm0, %v6783_v0 }
  0x52   : > { %1319 = vmatpush.msra.mxu3 %v227_v41  ;;  %1299 = vmatpush.msra.mxu2 %v226_v42 }
  0x54   : > { %6462 = vmatmul.msk.f32.vlgmr.msra.gmra.mxu1 %vm440_vm0, %v6783_v0  ;;  %6461 = vmatmul.msk.f32.vlgmr.msra.gmra.mxu0 %vm440_vm0, %v6783_v0 }
  0x55   : > { %1279 = vmatpush.msra.mxu1 %v225_v43  ;;  %1259 = vmatpush.msra.mxu0 %v224_v44 }
  0x59   : > { %6468 = vmatmul.msk.f32.vlgmr.msrb.gmra.mxu3 %vm440_vm0, %v6783_v0  ;;  %6467 = vmatmul.msk.f32.vlgmr.msrb.gmra.mxu2 %vm440_vm0, %v6783_v0 }
  0x5a   : > { %1399 = vmatpush.msrb.mxu3 %v231_v45  ;;  %1379 = vmatpush.msrb.mxu2 %v230_v46  ;;  %v271_v46 = vld [vmem:[%s6778_s16 + $0x2b8] sm:$0xff] }
  0x5c   : > { %6466 = vmatmul.msk.f32.vlgmr.msrb.gmra.mxu1 %vm440_vm0, %v6783_v0  ;;  %6465 = vmatmul.msk.f32.vlgmr.msrb.gmra.mxu0 %vm440_vm0, %v6783_v0 }
  0x5d   : > { %1359 = vmatpush.msrb.mxu1 %v229_v47  ;;  %1339 = vmatpush.msrb.mxu0 %v228_v48  ;;  %v270_v47 = vld [vmem:[%s6778_s16 + $0x2b0] sm:$0xff] }
  0x61   : > { %6472 = vmatmul.msk.f32.vlgmr.msra.gmra.mxu3 %vm440_vm0, %v6783_v0  ;;  %6471 = vmatmul.msk.f32.vlgmr.msra.gmra.mxu2 %vm440_vm0, %v6783_v0 }
  0x62   : > { %1479 = vmatpush.msra.mxu3 %v235_v49  ;;  %1459 = vmatpush.msra.mxu2 %v234_v50 }
  0x64   : > { %6470 = vmatmul.msk.f32.vlgmr.msra.gmra.mxu1 %vm440_vm0, %v6783_v0  ;;  %6469 = vmatmul.msk.f32.vlgmr.msra.gmra.mxu0 %vm440_vm0, %v6783_v0 }
  0x65   : > { %1439 = vmatpush.msra.mxu1 %v233_v51  ;;  %1419 = vmatpush.msra.mxu0 %v232_v52  ;;  %v269_v51 = vld [vmem:[%s6778_s16 + $0x2a8] sm:$0xff]  ;;  %v268_v52 = vld [vmem:[%s6778_s16 + $0x2a0] sm:$0xff] }
  0x69   : > { %6476 = vmatmul.msk.f32.vlgmr.msrb.gmra.mxu3 %vm440_vm0, %v6783_v0  ;;  %6475 = vmatmul.msk.f32.vlgmr.msrb.gmra.mxu2 %vm440_vm0, %v6783_v0 }
  0x6a   : > { %1559 = vmatpush.msrb.mxu3 %v239_v53  ;;  %1539 = vmatpush.msrb.mxu2 %v238_v54 }
  0x6c   : > { %6474 = vmatmul.msk.f32.vlgmr.msrb.gmra.mxu1 %vm440_vm0, %v6783_v0  ;;  %6473 = vmatmul.msk.f32.vlgmr.msrb.gmra.mxu0 %vm440_vm0, %v6783_v0 }
  0x6d   : > { %1519 = vmatpush.msrb.mxu1 %v237_v55  ;;  %1499 = vmatpush.msrb.mxu0 %v236_v56 }
  0x71   : > { %6480 = vmatmul.msk.f32.vlgmr.msra.gmra.mxu3 %vm440_vm0, %v6783_v0  ;;  %6479 = vmatmul.msk.f32.vlgmr.msra.gmra.mxu2 %vm440_vm0, %v6783_v0 }
  0x72   : > { %1639 = vmatpush.msra.mxu3 %v243_v57  ;;  %1619 = vmatpush.msra.mxu2 %v242_v58  ;;  %v275_v58 = vld [vmem:[%s6778_s16 + $0x2d8] sm:$0xff] }
  0x74   : > { %6478 = vmatmul.msk.f32.vlgmr.msra.gmra.mxu1 %vm440_vm0, %v6783_v0  ;;  %6477 = vmatmul.msk.f32.vlgmr.msra.gmra.mxu0 %vm440_vm0, %v6783_v0 }
  0x75   : > { %1599 = vmatpush.msra.mxu1 %v241_v59  ;;  %1579 = vmatpush.msra.mxu0 %v240_v60  ;;  %v274_v59 = vld [vmem:[%s6778_s16 + $0x2d0] sm:$0xff] }
  0x79   : > { %6484 = vmatmul.msk.f32.vlgmr.msrb.gmra.mxu3 %vm440_vm0, %v6783_v0  ;;  %6483 = vmatmul.msk.f32.vlgmr.msrb.gmra.mxu2 %vm440_vm0, %v6783_v0 }
  0x7a   : > { %1719 = vmatpush.msrb.mxu3 %v247_v61  ;;  %1699 = vmatpush.msrb.mxu2 %v246_v62 }
  0x7c   : > { %6482 = vmatmul.msk.f32.vlgmr.msrb.gmra.mxu1 %vm440_vm0, %v6783_v0  ;;  %6481 = vmatmul.msk.f32.vlgmr.msrb.gmra.mxu0 %vm440_vm0, %v6783_v0 }
  0x7d   : > { %1679 = vmatpush.msrb.mxu1 %v245_v63  ;;  %1659 = vmatpush.msrb.mxu0 %v244_v1  ;;  %v273_v63 = vld [vmem:[%s6778_s16 + $0x2c8] sm:$0xff]  ;;  %v272_v1 = vld [vmem:[%s6778_s16 + $0x2c0] sm:$0xff] }
  0x81   : > { %6488 = vmatmul.msk.f32.vlgmr.msra.gmra.mxu3 %vm440_vm0, %v6783_v0  ;;  %6487 = vmatmul.msk.f32.vlgmr.msra.gmra.mxu2 %vm440_vm0, %v6783_v0 }
  0x82   : > { %1799 = vmatpush.msra.mxu3 %v251_v2  ;;  %1779 = vmatpush.msra.mxu2 %v250_v3 }
  0x84   : > { %6486 = vmatmul.msk.f32.vlgmr.msra.gmra.mxu1 %vm440_vm0, %v6783_v0  ;;  %6485 = vmatmul.msk.f32.vlgmr.msra.gmra.mxu0 %vm440_vm0, %v6783_v0 }
  0x85   : > { %1759 = vmatpush.msra.mxu1 %v249_v4  ;;  %1739 = vmatpush.msra.mxu0 %v248_v5 }
  0x89   : > { %6492 = vmatmul.msk.f32.vlgmr.msrb.gmra.mxu3 %vm440_vm0, %v6783_v0  ;;  %6491 = vmatmul.msk.f32.vlgmr.msrb.gmra.mxu2 %vm440_vm0, %v6783_v0 }
  0x8a   : > { %1879 = vmatpush.msrb.mxu3 %v255_v6  ;;  %1859 = vmatpush.msrb.mxu2 %v254_v7  ;;  %v279_v7 = vld [vmem:[%s6778_s16 + $0x2f8] sm:$0xff] }
  0x8c   : > { %6490 = vmatmul.msk.f32.vlgmr.msrb.gmra.mxu1 %vm440_vm0, %v6783_v0  ;;  %6489 = vmatmul.msk.f32.vlgmr.msrb.gmra.mxu0 %vm440_vm0, %v6783_v0 }
  0x8d   : > { %1839 = vmatpush.msrb.mxu1 %v253_v8  ;;  %1819 = vmatpush.msrb.mxu0 %v252_v9  ;;  %v278_v8 = vld [vmem:[%s6778_s16 + $0x2f0] sm:$0xff] }
  0x91   : > { %6496 = vmatmul.msk.f32.vlgmr.msra.gmra.mxu3 %vm440_vm0, %v6783_v0  ;;  %6495 = vmatmul.msk.f32.vlgmr.msra.gmra.mxu2 %vm440_vm0, %v6783_v0  ;;  %v481_v12 = vpop.f32.mrf.mxu1  ;;  %v461_v13 = vpop.f32.mrf.mxu0 }
  0x92   : > { %v5820_v14 = vrot.slane %v481_v12, 4  ;;  %1959 = vmatpush.msra.mxu3 %v259_v10  ;;  %1939 = vmatpush.msra.mxu2 %v258_v11  ;;  %v277_v12 = vld [vmem:[%s6778_s16 + $0x2e8] sm:$0xff] }
  0x94   : > { %v521_v17 = vpop.f32.mrf.mxu3  ;;  %v5949_v18 = vsel %vm5948_vm1, %v461_v13, %v5820_v14  ;;  %v501_v19 = vpop.f32.mrf.mxu2  ;;  %6494 = vmatmul.msk.f32.vlgmr.msra.gmra.mxu1 %vm440_vm0, %v6783_v0  ;;  %6493 = vmatmul.msk.f32.vlgmr.msra.gmra.mxu0 %vm440_vm0, %v6783_v0  ;;  %v276_v13 = vld [vmem:[%s6778_s16 + $0x2e0] sm:$0xff] }
  0x95   : > { %v5821_v20 = vrot.slane %v521_v17, 4  ;;  %6205 = vst [vmem:[%s6995_s22] sm:$0xff] %v5949_v18  ;;  %1919 = vmatpush.msra.mxu1 %v257_v15  ;;  %1899 = vmatpush.msra.mxu0 %v256_v16 }
  0x97   : > { %v5950_v21 = vsel %vm5948_vm1, %v501_v19, %v5821_v20  ;;  %v283_v19 = vld [vmem:[%s6778_s16 + $0x318] sm:$0xff]  ;;  %v282_v20 = vld [vmem:[%s6778_s16 + $0x310] sm:$0xff] }
  0x98   : > { %6206 = vst [vmem:[%s6995_s22 + $0x8] sm:$0xff] %v5950_v21 }
  0x99   : > { %6500 = vmatmul.msk.f32.vlgmr.msrb.gmra.mxu3 %vm440_vm0, %v6783_v0  ;;  %6499 = vmatmul.msk.f32.vlgmr.msrb.gmra.mxu2 %vm440_vm0, %v6783_v0  ;;  %v561_v24 = vpop.f32.mrf.mxu1  ;;  %v541_v25 = vpop.f32.mrf.mxu0 }
  0x9a   : > { %v5822_v26 = vrot.slane %v561_v24, 4  ;;  %2039 = vmatpush.msrb.mxu3 %v263_v22  ;;  %2019 = vmatpush.msrb.mxu2 %v262_v23  ;;  %v281_v24 = vld [vmem:[%s6778_s16 + $0x308] sm:$0xff] }
  0x9c   : > { %v601_v29 = vpop.f32.mrf.mxu3  ;;  %v5951_v30 = vsel %vm5948_vm1, %v541_v25, %v5822_v26  ;;  %v581_v31 = vpop.f32.mrf.mxu2  ;;  %6498 = vmatmul.msk.f32.vlgmr.msrb.gmra.mxu1 %vm440_vm0, %v6783_v0  ;;  %6497 = vmatmul.msk.f32.vlgmr.msrb.gmra.mxu0 %vm440_vm0, %v6783_v0  ;;  %v280_v25 = vld [vmem:[%s6778_s16 + $0x300] sm:$0xff] }
  0x9d   : > { %v5823_v32 = vrot.slane %v601_v29, 4  ;;  %6207 = vst [vmem:[%s6995_s22 + $0x10] sm:$0xff] %v5951_v30  ;;  %1999 = vmatpush.msrb.mxu1 %v261_v27  ;;  %1979 = vmatpush.msrb.mxu0 %v260_v28 }
  0x9f   : > { %v5952_v33 = vsel %vm5948_vm1, %v581_v31, %v5823_v32  ;;  %v287_v31 = vld [vmem:[%s6778_s16 + $0x338] sm:$0xff]  ;;  %v286_v32 = vld [vmem:[%s6778_s16 + $0x330] sm:$0xff] }
  0xa0   : > { %6208 = vst [vmem:[%s6995_s22 + $0x18] sm:$0xff] %v5952_v33 }
  0xa1   : > { %6504 = vmatmul.msk.f32.vlgmr.msra.gmra.mxu3 %vm440_vm0, %v6783_v0  ;;  %6503 = vmatmul.msk.f32.vlgmr.msra.gmra.mxu2 %vm440_vm0, %v6783_v0  ;;  %v641_v36 = vpop.f32.mrf.mxu1  ;;  %v621_v37 = vpop.f32.mrf.mxu0 }
  0xa2   : > { %v5824_v38 = vrot.slane %v641_v36, 4  ;;  %2119 = vmatpush.msra.mxu3 %v267_v34  ;;  %2099 = vmatpush.msra.mxu2 %v266_v35  ;;  %v285_v36 = vld [vmem:[%s6778_s16 + $0x328] sm:$0xff] }
  0xa4   : > { %v681_v41 = vpop.f32.mrf.mxu3  ;;  %v5953_v42 = vsel %vm5948_vm1, %v621_v37, %v5824_v38  ;;  %v661_v43 = vpop.f32.mrf.mxu2  ;;  %6502 = vmatmul.msk.f32.vlgmr.msra.gmra.mxu1 %vm440_vm0, %v6783_v0  ;;  %6501 = vmatmul.msk.f32.vlgmr.msra.gmra.mxu0 %vm440_vm0, %v6783_v0  ;;  %v284_v37 = vld [vmem:[%s6778_s16 + $0x320] sm:$0xff] }
  0xa5   : > { %v5825_v44 = vrot.slane %v681_v41, 4  ;;  %6209 = vst [vmem:[%s6995_s22 + $0x20] sm:$0xff] %v5953_v42  ;;  %2079 = vmatpush.msra.mxu1 %v265_v39  ;;  %2059 = vmatpush.msra.mxu0 %v264_v40 }
  0xa7   : > { %v5954_v45 = vsel %vm5948_vm1, %v661_v43, %v5825_v44  ;;  %v291_v43 = vld [vmem:[%s6778_s16 + $0x358] sm:$0xff]  ;;  %v290_v44 = vld [vmem:[%s6778_s16 + $0x350] sm:$0xff] }
  0xa8   : > { %6210 = vst [vmem:[%s6995_s22 + $0x28] sm:$0xff] %v5954_v45 }
  0xa9   : > { %6508 = vmatmul.msk.f32.vlgmr.msrb.gmra.mxu3 %vm440_vm0, %v6783_v0  ;;  %6507 = vmatmul.msk.f32.vlgmr.msrb.gmra.mxu2 %vm440_vm0, %v6783_v0  ;;  %v721_v48 = vpop.f32.mrf.mxu1  ;;  %v701_v49 = vpop.f32.mrf.mxu0 }
  0xaa   : > { %v5826_v50 = vrot.slane %v721_v48, 4  ;;  %2199 = vmatpush.msrb.mxu3 %v271_v46  ;;  %2179 = vmatpush.msrb.mxu2 %v270_v47  ;;  %v289_v48 = vld [vmem:[%s6778_s16 + $0x348] sm:$0xff] }
  0xac   : > { %v761_v53 = vpop.f32.mrf.mxu3  ;;  %v5955_v54 = vsel %vm5948_vm1, %v701_v49, %v5826_v50  ;;  %v741_v55 = vpop.f32.mrf.mxu2  ;;  %6506 = vmatmul.msk.f32.vlgmr.msrb.gmra.mxu1 %vm440_vm0, %v6783_v0  ;;  %6505 = vmatmul.msk.f32.vlgmr.msrb.gmra.mxu0 %vm440_vm0, %v6783_v0  ;;  %v288_v49 = vld [vmem:[%s6778_s16 + $0x340] sm:$0xff] }
  0xad   : > { %v5827_v56 = vrot.slane %v761_v53, 4  ;;  %6211 = vst [vmem:[%s6995_s22 + $0x30] sm:$0xff] %v5955_v54  ;;  %2159 = vmatpush.msrb.mxu1 %v269_v51  ;;  %2139 = vmatpush.msrb.mxu0 %v268_v52 }
  0xaf   : > { %v5956_v57 = vsel %vm5948_vm1, %v741_v55, %v5827_v56  ;;  %v295_v55 = vld [vmem:[%s6778_s16 + $0x378] sm:$0xff]  ;;  %v294_v56 = vld [vmem:[%s6778_s16 + $0x370] sm:$0xff] }
  0xb0   : > { %6212 = vst [vmem:[%s6995_s22 + $0x38] sm:$0xff] %v5956_v57 }
  0xb1   : > { %6512 = vmatmul.msk.f32.vlgmr.msra.gmra.mxu3 %vm440_vm0, %v6783_v0  ;;  %6511 = vmatmul.msk.f32.vlgmr.msra.gmra.mxu2 %vm440_vm0, %v6783_v0  ;;  %v801_v60 = vpop.f32.mrf.mxu1  ;;  %v781_v61 = vpop.f32.mrf.mxu0 }
  0xb2   : > { %v5828_v62 = vrot.slane %v801_v60, 4  ;;  %2279 = vmatpush.msra.mxu3 %v275_v58  ;;  %2259 = vmatpush.msra.mxu2 %v274_v59  ;;  %v293_v60 = vld [vmem:[%s6778_s16 + $0x368] sm:$0xff] }
  0xb4   : > { %v841_v2 = vpop.f32.mrf.mxu3  ;;  %v5957_v3 = vsel %vm5948_vm1, %v781_v61, %v5828_v62  ;;  %v821_v4 = vpop.f32.mrf.mxu2  ;;  %6510 = vmatmul.msk.f32.vlgmr.msra.gmra.mxu1 %vm440_vm0, %v6783_v0  ;;  %6509 = vmatmul.msk.f32.vlgmr.msra.gmra.mxu0 %vm440_vm0, %v6783_v0  ;;  %v292_v61 = vld [vmem:[%s6778_s16 + $0x360] sm:$0xff] }
  0xb5   : > { %v5829_v5 = vrot.slane %v841_v2, 4  ;;  %6213 = vst [vmem:[%s6995_s22 + $0x40] sm:$0xff] %v5957_v3  ;;  %2239 = vmatpush.msra.mxu1 %v273_v63  ;;  %2219 = vmatpush.msra.mxu0 %v272_v1 }
  0xb7   : > { %v5958_v6 = vsel %vm5948_vm1, %v821_v4, %v5829_v5  ;;  %v299_v4 = vld [vmem:[%s6778_s16 + $0x398] sm:$0xff]  ;;  %v298_v5 = vld [vmem:[%s6778_s16 + $0x390] sm:$0xff] }
  0xb8   : > { %6214 = vst [vmem:[%s6995_s22 + $0x48] sm:$0xff] %v5958_v6 }
  0xb9   : > { %6516 = vmatmul.msk.f32.vlgmr.msrb.gmra.mxu3 %vm440_vm0, %v6783_v0  ;;  %6515 = vmatmul.msk.f32.vlgmr.msrb.gmra.mxu2 %vm440_vm0, %v6783_v0  ;;  %v881_v9 = vpop.f32.mrf.mxu1  ;;  %v861_v10 = vpop.f32.mrf.mxu0 }
  0xba   : > { %v5830_v11 = vrot.slane %v881_v9, 4  ;;  %2359 = vmatpush.msrb.mxu3 %v279_v7  ;;  %2339 = vmatpush.msrb.mxu2 %v278_v8  ;;  %v297_v9 = vld [vmem:[%s6778_s16 + $0x388] sm:$0xff] }
  0xbc   : > { %v921_v14 = vpop.f32.mrf.mxu3  ;;  %v5959_v15 = vsel %vm5948_vm1, %v861_v10, %v5830_v11  ;;  %v901_v16 = vpop.f32.mrf.mxu2  ;;  %6514 = vmatmul.msk.f32.vlgmr.msrb.gmra.mxu1 %vm440_vm0, %v6783_v0  ;;  %6513 = vmatmul.msk.f32.vlgmr.msrb.gmra.mxu0 %vm440_vm0, %v6783_v0  ;;  %v296_v10 = vld [vmem:[%s6778_s16 + $0x380] sm:$0xff] }
  0xbd   : > { %v5831_v17 = vrot.slane %v921_v14, 4  ;;  %6215 = vst [vmem:[%s6995_s22 + $0x50] sm:$0xff] %v5959_v15  ;;  %2319 = vmatpush.msrb.mxu1 %v277_v12  ;;  %2299 = vmatpush.msrb.mxu0 %v276_v13 }
  0xbf   : > { %v5960_v18 = vsel %vm5948_vm1, %v901_v16, %v5831_v17  ;;  %v303_v16 = vld [vmem:[%s6778_s16 + $0x3b8] sm:$0xff]  ;;  %v302_v17 = vld [vmem:[%s6778_s16 + $0x3b0] sm:$0xff] }
  0xc0   : > { %6216 = vst [vmem:[%s6995_s22 + $0x58] sm:$0xff] %v5960_v18 }
  0xc1   : > { %6520 = vmatmul.msk.f32.vlgmr.msra.gmra.mxu3 %vm440_vm0, %v6783_v0  ;;  %6519 = vmatmul.msk.f32.vlgmr.msra.gmra.mxu2 %vm440_vm0, %v6783_v0  ;;  %v961_v21 = vpop.f32.mrf.mxu1  ;;  %v941_v22 = vpop.f32.mrf.mxu0 }
  0xc2   : > { %v5832_v23 = vrot.slane %v961_v21, 4  ;;  %2439 = vmatpush.msra.mxu3 %v283_v19  ;;  %2419 = vmatpush.msra.mxu2 %v282_v20  ;;  %v301_v21 = vld [vmem:[%s6778_s16 + $0x3a8] sm:$0xff] }
  0xc4   : > { %v1001_v26 = vpop.f32.mrf.mxu3  ;;  %v5961_v27 = vsel %vm5948_vm1, %v941_v22, %v5832_v23  ;;  %v981_v28 = vpop.f32.mrf.mxu2  ;;  %6518 = vmatmul.msk.f32.vlgmr.msra.gmra.mxu1 %vm440_vm0, %v6783_v0  ;;  %6517 = vmatmul.msk.f32.vlgmr.msra.gmra.mxu0 %vm440_vm0, %v6783_v0  ;;  %v300_v22 = vld [vmem:[%s6778_s16 + $0x3a0] sm:$0xff] }
  0xc5   : > { %v5833_v29 = vrot.slane %v1001_v26, 4  ;;  %6217 = vst [vmem:[%s6995_s22 + $0x60] sm:$0xff] %v5961_v27  ;;  %2399 = vmatpush.msra.mxu1 %v281_v24  ;;  %2379 = vmatpush.msra.mxu0 %v280_v25 }
  0xc7   : > { %v5962_v30 = vsel %vm5948_vm1, %v981_v28, %v5833_v29  ;;  %v307_v28 = vld [vmem:[%s6778_s16 + $0x3d8] sm:$0xff]  ;;  %v306_v29 = vld [vmem:[%s6778_s16 + $0x3d0] sm:$0xff] }
  0xc8   : > { %6218 = vst [vmem:[%s6995_s22 + $0x68] sm:$0xff] %v5962_v30 }
  0xc9   : > { %6524 = vmatmul.msk.f32.vlgmr.msrb.gmra.mxu3 %vm440_vm0, %v6783_v0  ;;  %6523 = vmatmul.msk.f32.vlgmr.msrb.gmra.mxu2 %vm440_vm0, %v6783_v0  ;;  %v1041_v33 = vpop.f32.mrf.mxu1  ;;  %v1021_v34 = vpop.f32.mrf.mxu0 }
  0xca   : > { %v5834_v35 = vrot.slane %v1041_v33, 4  ;;  %2519 = vmatpush.msrb.mxu3 %v287_v31  ;;  %2499 = vmatpush.msrb.mxu2 %v286_v32  ;;  %v305_v33 = vld [vmem:[%s6778_s16 + $0x3c8] sm:$0xff] }
  0xcc   : > { %v1081_v38 = vpop.f32.mrf.mxu3  ;;  %v5963_v39 = vsel %vm5948_vm1, %v1021_v34, %v5834_v35  ;;  %v1061_v40 = vpop.f32.mrf.mxu2  ;;  %6522 = vmatmul.msk.f32.vlgmr.msrb.gmra.mxu1 %vm440_vm0, %v6783_v0  ;;  %6521 = vmatmul.msk.f32.vlgmr.msrb.gmra.mxu0 %vm440_vm0, %v6783_v0  ;;  %v304_v34 = vld [vmem:[%s6778_s16 + $0x3c0] sm:$0xff] }
  0xcd   : > { %v5835_v41 = vrot.slane %v1081_v38, 4  ;;  %6219 = vst [vmem:[%s6995_s22 + $0x70] sm:$0xff] %v5963_v39  ;;  %2479 = vmatpush.msrb.mxu1 %v285_v36  ;;  %2459 = vmatpush.msrb.mxu0 %v284_v37 }
  0xcf   : > { %v5964_v42 = vsel %vm5948_vm1, %v1061_v40, %v5835_v41  ;;  %v311_v40 = vld [vmem:[%s6778_s16 + $0x3f8] sm:$0xff]  ;;  %v310_v41 = vld [vmem:[%s6778_s16 + $0x3f0] sm:$0xff] }
  0xd0   : > { %6220 = vst [vmem:[%s6995_s22 + $0x78] sm:$0xff] %v5964_v42 }
  0xd1   : > { %6528 = vmatmul.msk.f32.vlgmr.msra.gmra.mxu3 %vm440_vm0, %v6783_v0  ;;  %6527 = vmatmul.msk.f32.vlgmr.msra.gmra.mxu2 %vm440_vm0, %v6783_v0  ;;  %v1121_v45 = vpop.f32.mrf.mxu1  ;;  %v1101_v46 = vpop.f32.mrf.mxu0 }
  0xd2   : > { %v5836_v47 = vrot.slane %v1121_v45, 4  ;;  %2599 = vmatpush.msra.mxu3 %v291_v43  ;;  %2579 = vmatpush.msra.mxu2 %v290_v44  ;;  %v309_v45 = vld [vmem:[%s6778_s16 + $0x3e8] sm:$0xff] }
  0xd4   : > { %v1161_v50 = vpop.f32.mrf.mxu3  ;;  %v5965_v51 = vsel %vm5948_vm1, %v1101_v46, %v5836_v47  ;;  %v1141_v52 = vpop.f32.mrf.mxu2  ;;  %6526 = vmatmul.msk.f32.vlgmr.msra.gmra.mxu1 %vm440_vm0, %v6783_v0  ;;  %6525 = vmatmul.msk.f32.vlgmr.msra.gmra.mxu0 %vm440_vm0, %v6783_v0  ;;  %v308_v46 = vld [vmem:[%s6778_s16 + $0x3e0] sm:$0xff] }
  0xd5   : > { %v5837_v53 = vrot.slane %v1161_v50, 4  ;;  %6221 = vst [vmem:[%s6995_s22 + $0x80] sm:$0xff] %v5965_v51  ;;  %2559 = vmatpush.msra.mxu1 %v289_v48  ;;  %2539 = vmatpush.msra.mxu0 %v288_v49  ;;  %v7211_v50 = vld [vmem:[%s7835_s1] sm:$0xf] }
  0xd7   : > { %v5966_v54 = vsel %vm5948_vm1, %v1141_v52, %v5837_v53  ;;  %v315_v52 = vld [vmem:[%s6778_s16 + $0x418] sm:$0xff]  ;;  %v314_v53 = vld [vmem:[%s6778_s16 + $0x410] sm:$0xff] }
  0xd8   : > { %6222 = vst [vmem:[%s6995_s22 + $0x88] sm:$0xff] %v5966_v54 }
  0xd9   : > { %6532 = vmatmul.msk.f32.vlgmr.msrb.gmra.mxu3 %vm440_vm0, %v6783_v0  ;;  %6531 = vmatmul.msk.f32.vlgmr.msrb.gmra.mxu2 %vm440_vm0, %v6783_v0  ;;  %v1201_v57 = vpop.f32.mrf.mxu1  ;;  %v1181_v58 = vpop.f32.mrf.mxu0 }
  0xda   : > { %v5838_v59 = vrot.slane %v1201_v57, 4  ;;  %2679 = vmatpush.msrb.mxu3 %v295_v55  ;;  %2659 = vmatpush.msrb.mxu2 %v294_v56  ;;  %v313_v57 = vld [vmem:[%s6778_s16 + $0x408] sm:$0xff] }
  0xdc   : > { %v1241_v62 = vpop.f32.mrf.mxu3  ;;  %v5967_v63 = vsel %vm5948_vm1, %v1181_v58, %v5838_v59  ;;  %v1221_v1 = vpop.f32.mrf.mxu2  ;;  %6530 = vmatmul.msk.f32.vlgmr.msrb.gmra.mxu1 %vm440_vm0, %v6783_v0  ;;  %6529 = vmatmul.msk.f32.vlgmr.msrb.gmra.mxu0 %vm440_vm0, %v6783_v0  ;;  %v312_v58 = vld [vmem:[%s6778_s16 + $0x400] sm:$0xff] }
  0xdd   : > { %v5839_v2 = vrot.slane %v1241_v62, 4  ;;  %6223 = vst [vmem:[%s6995_s22 + $0x90] sm:$0xff] %v5967_v63  ;;  %2639 = vmatpush.msrb.mxu1 %v293_v60  ;;  %2619 = vmatpush.msrb.mxu0 %v292_v61 }
  0xdf   : > { %v5968_v3 = vsel %vm5948_vm1, %v1221_v1, %v5839_v2  ;;  %v319_v1 = vld [vmem:[%s6778_s16 + $0x438] sm:$0xff]  ;;  %v318_v2 = vld [vmem:[%s6778_s16 + $0x430] sm:$0xff] }
  0xe0   : > { %6224 = vst [vmem:[%s6995_s22 + $0x98] sm:$0xff] %v5968_v3 }
  0xe1   : > { %6536 = vmatmul.msk.f32.vlgmr.msra.gmra.mxu3 %vm440_vm0, %v6783_v0  ;;  %6535 = vmatmul.msk.f32.vlgmr.msra.gmra.mxu2 %vm440_vm0, %v6783_v0  ;;  %v1281_v6 = vpop.f32.mrf.mxu1  ;;  %v1261_v7 = vpop.f32.mrf.mxu0 }
  0xe2   : > { %v5840_v8 = vrot.slane %v1281_v6, 4  ;;  %2759 = vmatpush.msra.mxu3 %v299_v4  ;;  %2739 = vmatpush.msra.mxu2 %v298_v5  ;;  %v317_v6 = vld [vmem:[%s6778_s16 + $0x428] sm:$0xff] }
  0xe4   : > { %v1321_v11 = vpop.f32.mrf.mxu3  ;;  %v5969_v12 = vsel %vm5948_vm1, %v1261_v7, %v5840_v8  ;;  %v1301_v13 = vpop.f32.mrf.mxu2  ;;  %6534 = vmatmul.msk.f32.vlgmr.msra.gmra.mxu1 %vm440_vm0, %v6783_v0  ;;  %6533 = vmatmul.msk.f32.vlgmr.msra.gmra.mxu0 %vm440_vm0, %v6783_v0  ;;  %v316_v7 = vld [vmem:[%s6778_s16 + $0x420] sm:$0xff] }
  0xe5   : > { %v5841_v14 = vrot.slane %v1321_v11, 4  ;;  %6225 = vst [vmem:[%s6995_s22 + $0xa0] sm:$0xff] %v5969_v12  ;;  %2719 = vmatpush.msra.mxu1 %v297_v9  ;;  %2699 = vmatpush.msra.mxu0 %v296_v10 }
  0xe7   : > { %v5970_v15 = vsel %vm5948_vm1, %v1301_v13, %v5841_v14  ;;  %v323_v13 = vld [vmem:[%s6778_s16 + $0x458] sm:$0xff]  ;;  %v322_v14 = vld [vmem:[%s6778_s16 + $0x450] sm:$0xff] }
  0xe8   : > { %6226 = vst [vmem:[%s6995_s22 + $0xa8] sm:$0xff] %v5970_v15 }
  0xe9   : > { %6540 = vmatmul.msk.f32.vlgmr.msrb.gmra.mxu3 %vm440_vm0, %v6783_v0  ;;  %6539 = vmatmul.msk.f32.vlgmr.msrb.gmra.mxu2 %vm440_vm0, %v6783_v0  ;;  %v1361_v18 = vpop.f32.mrf.mxu1  ;;  %v1341_v19 = vpop.f32.mrf.mxu0 }
  0xea   : > { %v5842_v20 = vrot.slane %v1361_v18, 4  ;;  %2839 = vmatpush.msrb.mxu3 %v303_v16  ;;  %2819 = vmatpush.msrb.mxu2 %v302_v17  ;;  %v321_v18 = vld [vmem:[%s6778_s16 + $0x448] sm:$0xff] }
  0xec   : > { %v1401_v23 = vpop.f32.mrf.mxu3  ;;  %v5971_v24 = vsel %vm5948_vm1, %v1341_v19, %v5842_v20  ;;  %v1381_v25 = vpop.f32.mrf.mxu2  ;;  %6538 = vmatmul.msk.f32.vlgmr.msrb.gmra.mxu1 %vm440_vm0, %v6783_v0  ;;  %6537 = vmatmul.msk.f32.vlgmr.msrb.gmra.mxu0 %vm440_vm0, %v6783_v0  ;;  %v320_v19 = vld [vmem:[%s6778_s16 + $0x440] sm:$0xff] }
  0xed   : > { %v5843_v26 = vrot.slane %v1401_v23, 4  ;;  %6227 = vst [vmem:[%s6995_s22 + $0xb0] sm:$0xff] %v5971_v24  ;;  %2799 = vmatpush.msrb.mxu1 %v301_v21  ;;  %2779 = vmatpush.msrb.mxu0 %v300_v22 }
  0xef   : > { %v5972_v27 = vsel %vm5948_vm1, %v1381_v25, %v5843_v26  ;;  %v327_v25 = vld [vmem:[%s6778_s16 + $0x478] sm:$0xff]  ;;  %v326_v26 = vld [vmem:[%s6778_s16 + $0x470] sm:$0xff] }
  0xf0   : > { %6228 = vst [vmem:[%s6995_s22 + $0xb8] sm:$0xff] %v5972_v27 }
  0xf1   : > { %6544 = vmatmul.msk.f32.vlgmr.msra.gmra.mxu3 %vm440_vm0, %v6783_v0  ;;  %6543 = vmatmul.msk.f32.vlgmr.msra.gmra.mxu2 %vm440_vm0, %v6783_v0  ;;  %v1441_v30 = vpop.f32.mrf.mxu1  ;;  %v1421_v31 = vpop.f32.mrf.mxu0 }
  0xf2   : > { %v5844_v32 = vrot.slane %v1441_v30, 4  ;;  %2919 = vmatpush.msra.mxu3 %v307_v28  ;;  %2899 = vmatpush.msra.mxu2 %v306_v29  ;;  %v325_v30 = vld [vmem:[%s6778_s16 + $0x468] sm:$0xff] }
  0xf4   : > { %v1481_v35 = vpop.f32.mrf.mxu3  ;;  %v5973_v36 = vsel %vm5948_vm1, %v1421_v31, %v5844_v32  ;;  %v1461_v37 = vpop.f32.mrf.mxu2  ;;  %6542 = vmatmul.msk.f32.vlgmr.msra.gmra.mxu1 %vm440_vm0, %v6783_v0  ;;  %6541 = vmatmul.msk.f32.vlgmr.msra.gmra.mxu0 %vm440_vm0, %v6783_v0  ;;  %v324_v31 = vld [vmem:[%s6778_s16 + $0x460] sm:$0xff] }
  0xf5   : > { %v5845_v38 = vrot.slane %v1481_v35, 4  ;;  %6229 = vst [vmem:[%s6995_s22 + $0xc0] sm:$0xff] %v5973_v36  ;;  %2879 = vmatpush.msra.mxu1 %v305_v33  ;;  %2859 = vmatpush.msra.mxu0 %v304_v34 }
  0xf7   : > { %v5974_v39 = vsel %vm5948_vm1, %v1461_v37, %v5845_v38  ;;  %v331_v37 = vld [vmem:[%s6778_s16 + $0x498] sm:$0xff]  ;;  %v330_v38 = vld [vmem:[%s6778_s16 + $0x490] sm:$0xff] }
  0xf8   : > { %6230 = vst [vmem:[%s6995_s22 + $0xc8] sm:$0xff] %v5974_v39 }
  0xf9   : > { %6548 = vmatmul.msk.f32.vlgmr.msrb.gmra.mxu3 %vm440_vm0, %v6783_v0  ;;  %6547 = vmatmul.msk.f32.vlgmr.msrb.gmra.mxu2 %vm440_vm0, %v6783_v0  ;;  %v1521_v42 = vpop.f32.mrf.mxu1  ;;  %v1501_v43 = vpop.f32.mrf.mxu0 }
  0xfa   : > { %v5846_v44 = vrot.slane %v1521_v42, 4  ;;  %2999 = vmatpush.msrb.mxu3 %v311_v40  ;;  %2979 = vmatpush.msrb.mxu2 %v310_v41  ;;  %v329_v42 = vld [vmem:[%s6778_s16 + $0x488] sm:$0xff] }
  0xfc   : > { %v1561_v47 = vpop.f32.mrf.mxu3  ;;  %v5975_v48 = vsel %vm5948_vm1, %v1501_v43, %v5846_v44  ;;  %v1541_v49 = vpop.f32.mrf.mxu2  ;;  %6546 = vmatmul.msk.f32.vlgmr.msrb.gmra.mxu1 %vm440_vm0, %v7211_v50  ;;  %6545 = vmatmul.msk.f32.vlgmr.msrb.gmra.mxu0 %vm440_vm0, %v7211_v50  ;;  %v328_v43 = vld [vmem:[%s6778_s16 + $0x480] sm:$0xff] }
  0xfd   : > { %v5847_v0 = vrot.slane %v1561_v47, 4  ;;  %6231 = vst [vmem:[%s6995_s22 + $0xd0] sm:$0xff] %v5975_v48  ;;  %2959 = vmatpush.msrb.mxu1 %v309_v45  ;;  %2939 = vmatpush.msrb.mxu0 %v308_v46 }
  0xff   : > { %v5976_v51 = vsel %vm5948_vm1, %v1541_v49, %v5847_v0  ;;  %v335_v49 = vld [vmem:[%s6778_s16 + $0x4b8] sm:$0xff]  ;;  %v334_v0 = vld [vmem:[%s6778_s16 + $0x4b0] sm:$0xff] }
 0x100   : > { %6232 = vst [vmem:[%s6995_s22 + $0xd8] sm:$0xff] %v5976_v51 }
 0x101   : > { %6552 = vmatmul.msk.f32.vlgmr.msra.gmra.mxu3 %vm440_vm0, %v7211_v50  ;;  %6551 = vmatmul.msk.f32.vlgmr.msra.gmra.mxu2 %vm440_vm0, %v7211_v50  ;;  %v1601_v54 = vpop.f32.mrf.mxu1  ;;  %v1581_v55 = vpop.f32.mrf.mxu0 }
 0x102   : > { %v5848_v56 = vrot.slane %v1601_v54, 4  ;;  %3079 = vmatpush.msra.mxu3 %v315_v52  ;;  %3059 = vmatpush.msra.mxu2 %v314_v53  ;;  %v333_v54 = vld [vmem:[%s6778_s16 + $0x4a8] sm:$0xff] }
 0x104   : > { %v1641_v59 = vpop.f32.mrf.mxu3  ;;  %v5977_v60 = vsel %vm5948_vm1, %v1581_v55, %v5848_v56  ;;  %v1621_v61 = vpop.f32.mrf.mxu2  ;;  %6550 = vmatmul.msk.f32.vlgmr.msra.gmra.mxu1 %vm440_vm0, %v7211_v50  ;;  %6549 = vmatmul.msk.f32.vlgmr.msra.gmra.mxu0 %vm440_vm0, %v7211_v50  ;;  %v332_v55 = vld [vmem:[%s6778_s16 + $0x4a0] sm:$0xff] }
 0x105   : > { %v5849_v62 = vrot.slane %v1641_v59, 4  ;;  %6233 = vst [vmem:[%s6995_s22 + $0xe0] sm:$0xff] %v5977_v60  ;;  %3039 = vmatpush.msra.mxu1 %v313_v57  ;;  %3019 = vmatpush.msra.mxu0 %v312_v58 }
 0x107   : > { %v5978_v63 = vsel %vm5948_vm1, %v1621_v61, %v5849_v62  ;;  %v339_v61 = vld [vmem:[%s6778_s16 + $0x4d8] sm:$0xff]  ;;  %v338_v62 = vld [vmem:[%s6778_s16 + $0x4d0] sm:$0xff] }
 0x108   : > { %6234 = vst [vmem:[%s6995_s22 + $0xe8] sm:$0xff] %v5978_v63 }
 0x109   : > { %6556 = vmatmul.msk.f32.vlgmr.msrb.gmra.mxu3 %vm440_vm0, %v7211_v50  ;;  %6555 = vmatmul.msk.f32.vlgmr.msrb.gmra.mxu2 %vm440_vm0, %v7211_v50  ;;  %v1681_v3 = vpop.f32.mrf.mxu1  ;;  %v1661_v4 = vpop.f32.mrf.mxu0 }
 0x10a   : > { %v5850_v5 = vrot.slane %v1681_v3, 4  ;;  %3159 = vmatpush.msrb.mxu3 %v319_v1  ;;  %3139 = vmatpush.msrb.mxu2 %v318_v2  ;;  %v337_v3 = vld [vmem:[%s6778_s16 + $0x4c8] sm:$0xff] }
 0x10c   : > { %v1721_v8 = vpop.f32.mrf.mxu3  ;;  %v5979_v9 = vsel %vm5948_vm1, %v1661_v4, %v5850_v5  ;;  %v1701_v10 = vpop.f32.mrf.mxu2  ;;  %6554 = vmatmul.msk.f32.vlgmr.msrb.gmra.mxu1 %vm440_vm0, %v7211_v50  ;;  %6553 = vmatmul.msk.f32.vlgmr.msrb.gmra.mxu0 %vm440_vm0, %v7211_v50  ;;  %v336_v4 = vld [vmem:[%s6778_s16 + $0x4c0] sm:$0xff] }
 0x10d   : > { %v5851_v11 = vrot.slane %v1721_v8, 4  ;;  %6235 = vst [vmem:[%s6995_s22 + $0xf0] sm:$0xff] %v5979_v9  ;;  %3119 = vmatpush.msrb.mxu1 %v317_v6  ;;  %3099 = vmatpush.msrb.mxu0 %v316_v7 }
 0x10f   : > { %v5980_v12 = vsel %vm5948_vm1, %v1701_v10, %v5851_v11  ;;  %v343_v10 = vld [vmem:[%s6778_s16 + $0x4f8] sm:$0xff]  ;;  %v342_v11 = vld [vmem:[%s6778_s16 + $0x4f0] sm:$0xff] }
 0x110   : > { %6236 = vst [vmem:[%s6995_s22 + $0xf8] sm:$0xff] %v5980_v12 }
 0x111   : > { %6560 = vmatmul.msk.f32.vlgmr.msra.gmra.mxu3 %vm440_vm0, %v7211_v50  ;;  %6559 = vmatmul.msk.f32.vlgmr.msra.gmra.mxu2 %vm440_vm0, %v7211_v50  ;;  %v1761_v15 = vpop.f32.mrf.mxu1  ;;  %v1741_v16 = vpop.f32.mrf.mxu0 }
 0x112   : > { %v5852_v17 = vrot.slane %v1761_v15, 4  ;;  %3239 = vmatpush.msra.mxu3 %v323_v13  ;;  %3219 = vmatpush.msra.mxu2 %v322_v14  ;;  %v341_v15 = vld [vmem:[%s6778_s16 + $0x4e8] sm:$0xff] }
 0x114   : > { %v1801_v20 = vpop.f32.mrf.mxu3  ;;  %v5981_v21 = vsel %vm5948_vm1, %v1741_v16, %v5852_v17  ;;  %v1781_v22 = vpop.f32.mrf.mxu2  ;;  %6558 = vmatmul.msk.f32.vlgmr.msra.gmra.mxu1 %vm440_vm0, %v7211_v50  ;;  %6557 = vmatmul.msk.f32.vlgmr.msra.gmra.mxu0 %vm440_vm0, %v7211_v50  ;;  %v340_v16 = vld [vmem:[%s6778_s16 + $0x4e0] sm:$0xff] }
 0x115   : > { %v5853_v23 = vrot.slane %v1801_v20, 4  ;;  %6237 = vst [vmem:[%s6995_s22 + $0x100] sm:$0xff] %v5981_v21  ;;  %3199 = vmatpush.msra.mxu1 %v321_v18  ;;  %3179 = vmatpush.msra.mxu0 %v320_v19 }
 0x117   : > { %v5982_v24 = vsel %vm5948_vm1, %v1781_v22, %v5853_v23  ;;  %v347_v22 = vld [vmem:[%s6778_s16 + $0x518] sm:$0xff]  ;;  %v346_v23 = vld [vmem:[%s6778_s16 + $0x510] sm:$0xff] }
 0x118   : > { %6238 = vst [vmem:[%s6995_s22 + $0x108] sm:$0xff] %v5982_v24 }
 0x119   : > { %6564 = vmatmul.msk.f32.vlgmr.msrb.gmra.mxu3 %vm440_vm0, %v7211_v50  ;;  %6563 = vmatmul.msk.f32.vlgmr.msrb.gmra.mxu2 %vm440_vm0, %v7211_v50  ;;  %v1841_v27 = vpop.f32.mrf.mxu1  ;;  %v1821_v28 = vpop.f32.mrf.mxu0 }
 0x11a   : > { %v5854_v29 = vrot.slane %v1841_v27, 4  ;;  %3319 = vmatpush.msrb.mxu3 %v327_v25  ;;  %3299 = vmatpush.msrb.mxu2 %v326_v26  ;;  %v345_v27 = vld [vmem:[%s6778_s16 + $0x508] sm:$0xff] }
 0x11c   : > { %v1881_v32 = vpop.f32.mrf.mxu3  ;;  %v5983_v33 = vsel %vm5948_vm1, %v1821_v28, %v5854_v29  ;;  %v1861_v34 = vpop.f32.mrf.mxu2  ;;  %6562 = vmatmul.msk.f32.vlgmr.msrb.gmra.mxu1 %vm440_vm0, %v7211_v50  ;;  %6561 = vmatmul.msk.f32.vlgmr.msrb.gmra.mxu0 %vm440_vm0, %v7211_v50  ;;  %v344_v28 = vld [vmem:[%s6778_s16 + $0x500] sm:$0xff] }
 0x11d   : > { %v5855_v35 = vrot.slane %v1881_v32, 4  ;;  %6239 = vst [vmem:[%s6995_s22 + $0x110] sm:$0xff] %v5983_v33  ;;  %3279 = vmatpush.msrb.mxu1 %v325_v30  ;;  %3259 = vmatpush.msrb.mxu0 %v324_v31 }
 0x11f   : > { %v5984_v36 = vsel %vm5948_vm1, %v1861_v34, %v5855_v35  ;;  %v351_v34 = vld [vmem:[%s6778_s16 + $0x538] sm:$0xff]  ;;  %v350_v35 = vld [vmem:[%s6778_s16 + $0x530] sm:$0xff] }
 0x120   : > { %6240 = vst [vmem:[%s6995_s22 + $0x118] sm:$0xff] %v5984_v36 }
 0x121   : > { %6568 = vmatmul.msk.f32.vlgmr.msra.gmra.mxu3 %vm440_vm0, %v7211_v50  ;;  %6567 = vmatmul.msk.f32.vlgmr.msra.gmra.mxu2 %vm440_vm0, %v7211_v50  ;;  %v1921_v39 = vpop.f32.mrf.mxu1  ;;  %v1901_v40 = vpop.f32.mrf.mxu0 }
 0x122   : > { %v5856_v41 = vrot.slane %v1921_v39, 4  ;;  %3399 = vmatpush.msra.mxu3 %v331_v37  ;;  %3379 = vmatpush.msra.mxu2 %v330_v38  ;;  %v349_v39 = vld [vmem:[%s6778_s16 + $0x528] sm:$0xff] }
 0x124   : > { %v1961_v44 = vpop.f32.mrf.mxu3  ;;  %v5985_v45 = vsel %vm5948_vm1, %v1901_v40, %v5856_v41  ;;  %v1941_v46 = vpop.f32.mrf.mxu2  ;;  %6566 = vmatmul.msk.f32.vlgmr.msra.gmra.mxu1 %vm440_vm0, %v7211_v50  ;;  %6565 = vmatmul.msk.f32.vlgmr.msra.gmra.mxu0 %vm440_vm0, %v7211_v50  ;;  %v348_v40 = vld [vmem:[%s6778_s16 + $0x520] sm:$0xff] }
 0x125   : > { %v5857_v47 = vrot.slane %v1961_v44, 4  ;;  %6241 = vst [vmem:[%s6995_s22 + $0x120] sm:$0xff] %v5985_v45  ;;  %3359 = vmatpush.msra.mxu1 %v329_v42  ;;  %3339 = vmatpush.msra.mxu0 %v328_v43 }
 0x127   : > { %v5986_v48 = vsel %vm5948_vm1, %v1941_v46, %v5857_v47  ;;  %v355_v46 = vld [vmem:[%s6778_s16 + $0x558] sm:$0xff]  ;;  %v354_v47 = vld [vmem:[%s6778_s16 + $0x550] sm:$0xff] }
 0x128   : > { %6242 = vst [vmem:[%s6995_s22 + $0x128] sm:$0xff] %v5986_v48 }
 0x129   : > { %6572 = vmatmul.msk.f32.vlgmr.msrb.gmra.mxu3 %vm440_vm0, %v7211_v50  ;;  %6571 = vmatmul.msk.f32.vlgmr.msrb.gmra.mxu2 %vm440_vm0, %v7211_v50  ;;  %v2001_v51 = vpop.f32.mrf.mxu1  ;;  %v1981_v52 = vpop.f32.mrf.mxu0 }
 0x12a   : > { %v5858_v53 = vrot.slane %v2001_v51, 4  ;;  %3479 = vmatpush.msrb.mxu3 %v335_v49  ;;  %3459 = vmatpush.msrb.mxu2 %v334_v0  ;;  %v353_v51 = vld [vmem:[%s6778_s16 + $0x548] sm:$0xff] }
 0x12c   : > { %v2041_v56 = vpop.f32.mrf.mxu3  ;;  %v5987_v57 = vsel %vm5948_vm1, %v1981_v52, %v5858_v53  ;;  %v2021_v58 = vpop.f32.mrf.mxu2  ;;  %6570 = vmatmul.msk.f32.vlgmr.msrb.gmra.mxu1 %vm440_vm0, %v7211_v50  ;;  %6569 = vmatmul.msk.f32.vlgmr.msrb.gmra.mxu0 %vm440_vm0, %v7211_v50  ;;  %v352_v52 = vld [vmem:[%s6778_s16 + $0x540] sm:$0xff] }
 0x12d   : > { %v5859_v59 = vrot.slane %v2041_v56, 4  ;;  %6243 = vst [vmem:[%s6995_s22 + $0x130] sm:$0xff] %v5987_v57  ;;  %3439 = vmatpush.msrb.mxu1 %v333_v54  ;;  %3419 = vmatpush.msrb.mxu0 %v332_v55 }
 0x12f   : > { %v5988_v60 = vsel %vm5948_vm1, %v2021_v58, %v5859_v59  ;;  %v359_v58 = vld [vmem:[%s6778_s16 + $0x578] sm:$0xff]  ;;  %v358_v59 = vld [vmem:[%s6778_s16 + $0x570] sm:$0xff] }
 0x130   : > { %6244 = vst [vmem:[%s6995_s22 + $0x138] sm:$0xff] %v5988_v60 }
 0x131   : > { %6576 = vmatmul.msk.f32.vlgmr.msra.gmra.mxu3 %vm440_vm0, %v7211_v50  ;;  %6575 = vmatmul.msk.f32.vlgmr.msra.gmra.mxu2 %vm440_vm0, %v7211_v50  ;;  %v2081_v63 = vpop.f32.mrf.mxu1  ;;  %v2061_v1 = vpop.f32.mrf.mxu0 }
 0x132   : > { %v5860_v2 = vrot.slane %v2081_v63, 4  ;;  %3559 = vmatpush.msra.mxu3 %v339_v61  ;;  %3539 = vmatpush.msra.mxu2 %v338_v62  ;;  %v357_v63 = vld [vmem:[%s6778_s16 + $0x568] sm:$0xff] }
 0x134   : > { %v2121_v5 = vpop.f32.mrf.mxu3  ;;  %v5989_v6 = vsel %vm5948_vm1, %v2061_v1, %v5860_v2  ;;  %v2101_v7 = vpop.f32.mrf.mxu2  ;;  %6574 = vmatmul.msk.f32.vlgmr.msra.gmra.mxu1 %vm440_vm0, %v7211_v50  ;;  %6573 = vmatmul.msk.f32.vlgmr.msra.gmra.mxu0 %vm440_vm0, %v7211_v50  ;;  %v356_v1 = vld [vmem:[%s6778_s16 + $0x560] sm:$0xff] }
 0x135   : > { %v5861_v8 = vrot.slane %v2121_v5, 4  ;;  %6245 = vst [vmem:[%s6995_s22 + $0x140] sm:$0xff] %v5989_v6  ;;  %3519 = vmatpush.msra.mxu1 %v337_v3  ;;  %3499 = vmatpush.msra.mxu0 %v336_v4 }
 0x137   : > { %v5990_v9 = vsel %vm5948_vm1, %v2101_v7, %v5861_v8  ;;  %v363_v7 = vld [vmem:[%s6778_s16 + $0x598] sm:$0xff]  ;;  %v362_v8 = vld [vmem:[%s6778_s16 + $0x590] sm:$0xff] }
 0x138   : > { %6246 = vst [vmem:[%s6995_s22 + $0x148] sm:$0xff] %v5990_v9 }
 0x139   : > { %6580 = vmatmul.msk.f32.vlgmr.msrb.gmra.mxu3 %vm440_vm0, %v7211_v50  ;;  %6579 = vmatmul.msk.f32.vlgmr.msrb.gmra.mxu2 %vm440_vm0, %v7211_v50  ;;  %v2161_v12 = vpop.f32.mrf.mxu1  ;;  %v2141_v13 = vpop.f32.mrf.mxu0 }
 0x13a   : > { %v5862_v14 = vrot.slane %v2161_v12, 4  ;;  %3639 = vmatpush.msrb.mxu3 %v343_v10  ;;  %3619 = vmatpush.msrb.mxu2 %v342_v11  ;;  %v361_v12 = vld [vmem:[%s6778_s16 + $0x588] sm:$0xff] }
 0x13c   : > { %v2201_v17 = vpop.f32.mrf.mxu3  ;;  %v5991_v18 = vsel %vm5948_vm1, %v2141_v13, %v5862_v14  ;;  %v2181_v19 = vpop.f32.mrf.mxu2  ;;  %6578 = vmatmul.msk.f32.vlgmr.msrb.gmra.mxu1 %vm440_vm0, %v7211_v50  ;;  %6577 = vmatmul.msk.f32.vlgmr.msrb.gmra.mxu0 %vm440_vm0, %v7211_v50  ;;  %v360_v13 = vld [vmem:[%s6778_s16 + $0x580] sm:$0xff] }
 0x13d   : > { %v5863_v20 = vrot.slane %v2201_v17, 4  ;;  %6247 = vst [vmem:[%s6995_s22 + $0x150] sm:$0xff] %v5991_v18  ;;  %3599 = vmatpush.msrb.mxu1 %v341_v15  ;;  %3579 = vmatpush.msrb.mxu0 %v340_v16 }
 0x13f   : > { %v5992_v21 = vsel %vm5948_vm1, %v2181_v19, %v5863_v20  ;;  %v367_v19 = vld [vmem:[%s6778_s16 + $0x5b8] sm:$0xff]  ;;  %v366_v20 = vld [vmem:[%s6778_s16 + $0x5b0] sm:$0xff] }
 0x140   : > { %6248 = vst [vmem:[%s6995_s22 + $0x158] sm:$0xff] %v5992_v21 }
 0x141   : > { %6584 = vmatmul.msk.f32.vlgmr.msra.gmra.mxu3 %vm440_vm0, %v7211_v50  ;;  %6583 = vmatmul.msk.f32.vlgmr.msra.gmra.mxu2 %vm440_vm0, %v7211_v50  ;;  %v2241_v24 = vpop.f32.mrf.mxu1  ;;  %v2221_v25 = vpop.f32.mrf.mxu0 }
 0x142   : > { %v5864_v26 = vrot.slane %v2241_v24, 4  ;;  %3719 = vmatpush.msra.mxu3 %v347_v22  ;;  %3699 = vmatpush.msra.mxu2 %v346_v23  ;;  %v365_v24 = vld [vmem:[%s6778_s16 + $0x5a8] sm:$0xff] }
 0x144   : > { %v2281_v29 = vpop.f32.mrf.mxu3  ;;  %v5993_v30 = vsel %vm5948_vm1, %v2221_v25, %v5864_v26  ;;  %v2261_v31 = vpop.f32.mrf.mxu2  ;;  %6582 = vmatmul.msk.f32.vlgmr.msra.gmra.mxu1 %vm440_vm0, %v7211_v50  ;;  %6581 = vmatmul.msk.f32.vlgmr.msra.gmra.mxu0 %vm440_vm0, %v7211_v50  ;;  %v364_v25 = vld [vmem:[%s6778_s16 + $0x5a0] sm:$0xff] }
 0x145   : > { %v5865_v32 = vrot.slane %v2281_v29, 4  ;;  %6249 = vst [vmem:[%s6995_s22 + $0x160] sm:$0xff] %v5993_v30  ;;  %3679 = vmatpush.msra.mxu1 %v345_v27  ;;  %3659 = vmatpush.msra.mxu0 %v344_v28 }
 0x147   : > { %v5994_v33 = vsel %vm5948_vm1, %v2261_v31, %v5865_v32  ;;  %v371_v31 = vld [vmem:[%s6778_s16 + $0x5d8] sm:$0xff]  ;;  %v370_v32 = vld [vmem:[%s6778_s16 + $0x5d0] sm:$0xff] }
 0x148   : > { %6250 = vst [vmem:[%s6995_s22 + $0x168] sm:$0xff] %v5994_v33 }
 0x149   : > { %6588 = vmatmul.msk.f32.vlgmr.msrb.gmra.mxu3 %vm440_vm0, %v7211_v50  ;;  %6587 = vmatmul.msk.f32.vlgmr.msrb.gmra.mxu2 %vm440_vm0, %v7211_v50  ;;  %v2321_v36 = vpop.f32.mrf.mxu1  ;;  %v2301_v37 = vpop.f32.mrf.mxu0 }
 0x14a   : > { %v5866_v38 = vrot.slane %v2321_v36, 4  ;;  %3799 = vmatpush.msrb.mxu3 %v351_v34  ;;  %3779 = vmatpush.msrb.mxu2 %v350_v35  ;;  %v369_v36 = vld [vmem:[%s6778_s16 + $0x5c8] sm:$0xff] }
 0x14c   : > { %v2361_v41 = vpop.f32.mrf.mxu3  ;;  %v5995_v42 = vsel %vm5948_vm1, %v2301_v37, %v5866_v38  ;;  %v2341_v43 = vpop.f32.mrf.mxu2  ;;  %6586 = vmatmul.msk.f32.vlgmr.msrb.gmra.mxu1 %vm440_vm0, %v7211_v50  ;;  %6585 = vmatmul.msk.f32.vlgmr.msrb.gmra.mxu0 %vm440_vm0, %v7211_v50  ;;  %v368_v37 = vld [vmem:[%s6778_s16 + $0x5c0] sm:$0xff] }
 0x14d   : > { %v5867_v44 = vrot.slane %v2361_v41, 4  ;;  %6251 = vst [vmem:[%s6995_s22 + $0x170] sm:$0xff] %v5995_v42  ;;  %3759 = vmatpush.msrb.mxu1 %v349_v39  ;;  %3739 = vmatpush.msrb.mxu0 %v348_v40 }
 0x14f   : > { %v5996_v45 = vsel %vm5948_vm1, %v2341_v43, %v5867_v44  ;;  %v375_v43 = vld [vmem:[%s6778_s16 + $0x5f8] sm:$0xff]  ;;  %v374_v44 = vld [vmem:[%s6778_s16 + $0x5f0] sm:$0xff] }
 0x150   : > { %6252 = vst [vmem:[%s6995_s22 + $0x178] sm:$0xff] %v5996_v45 }
 0x151   : > { %6592 = vmatmul.msk.f32.vlgmr.msra.gmra.mxu3 %vm440_vm0, %v7211_v50  ;;  %6591 = vmatmul.msk.f32.vlgmr.msra.gmra.mxu2 %vm440_vm0, %v7211_v50  ;;  %v2401_v48 = vpop.f32.mrf.mxu1  ;;  %v2381_v49 = vpop.f32.mrf.mxu0 }
 0x152   : > { %v5868_v0 = vrot.slane %v2401_v48, 4  ;;  %3879 = vmatpush.msra.mxu3 %v355_v46  ;;  %3859 = vmatpush.msra.mxu2 %v354_v47  ;;  %v373_v48 = vld [vmem:[%s6778_s16 + $0x5e8] sm:$0xff] }
 0x154   : > { %v2441_v53 = vpop.f32.mrf.mxu3  ;;  %v5997_v54 = vsel %vm5948_vm1, %v2381_v49, %v5868_v0  ;;  %v2421_v55 = vpop.f32.mrf.mxu2  ;;  %6590 = vmatmul.msk.f32.vlgmr.msra.gmra.mxu1 %vm440_vm0, %v7211_v50  ;;  %6589 = vmatmul.msk.f32.vlgmr.msra.gmra.mxu0 %vm440_vm0, %v7211_v50  ;;  %v372_v49 = vld [vmem:[%s6778_s16 + $0x5e0] sm:$0xff] }
 0x155   : > { %v5869_v56 = vrot.slane %v2441_v53, 4  ;;  %6253 = vst [vmem:[%s6995_s22 + $0x180] sm:$0xff] %v5997_v54  ;;  %3839 = vmatpush.msra.mxu1 %v353_v51  ;;  %3819 = vmatpush.msra.mxu0 %v352_v52 }
 0x157   : > { %v5998_v57 = vsel %vm5948_vm1, %v2421_v55, %v5869_v56  ;;  %v379_v55 = vld [vmem:[%s6778_s16 + $0x618] sm:$0xff]  ;;  %v378_v56 = vld [vmem:[%s6778_s16 + $0x610] sm:$0xff] }
 0x158   : > { %6254 = vst [vmem:[%s6995_s22 + $0x188] sm:$0xff] %v5998_v57 }
 0x159   : > { %6596 = vmatmul.msk.f32.vlgmr.msrb.gmra.mxu3 %vm440_vm0, %v7211_v50  ;;  %6595 = vmatmul.msk.f32.vlgmr.msrb.gmra.mxu2 %vm440_vm0, %v7211_v50  ;;  %v2481_v60 = vpop.f32.mrf.mxu1  ;;  %v2461_v61 = vpop.f32.mrf.mxu0 }
 0x15a   : > { %v5870_v62 = vrot.slane %v2481_v60, 4  ;;  %3959 = vmatpush.msrb.mxu3 %v359_v58  ;;  %3939 = vmatpush.msrb.mxu2 %v358_v59  ;;  %v377_v60 = vld [vmem:[%s6778_s16 + $0x608] sm:$0xff] }
 0x15c   : > { %v2521_v2 = vpop.f32.mrf.mxu3  ;;  %v5999_v3 = vsel %vm5948_vm1, %v2461_v61, %v5870_v62  ;;  %v2501_v4 = vpop.f32.mrf.mxu2  ;;  %6594 = vmatmul.msk.f32.vlgmr.msrb.gmra.mxu1 %vm440_vm0, %v7211_v50  ;;  %6593 = vmatmul.msk.f32.vlgmr.msrb.gmra.mxu0 %vm440_vm0, %v7211_v50  ;;  %v376_v61 = vld [vmem:[%s6778_s16 + $0x600] sm:$0xff] }
 0x15d   : > { %v5871_v5 = vrot.slane %v2521_v2, 4  ;;  %6255 = vst [vmem:[%s6995_s22 + $0x190] sm:$0xff] %v5999_v3  ;;  %3919 = vmatpush.msrb.mxu1 %v357_v63  ;;  %3899 = vmatpush.msrb.mxu0 %v356_v1 }
 0x15f   : > { %v6000_v6 = vsel %vm5948_vm1, %v2501_v4, %v5871_v5  ;;  %v383_v4 = vld [vmem:[%s6778_s16 + $0x638] sm:$0xff]  ;;  %v382_v5 = vld [vmem:[%s6778_s16 + $0x630] sm:$0xff] }
 0x160   : > { %6256 = vst [vmem:[%s6995_s22 + $0x198] sm:$0xff] %v6000_v6 }
 0x161   : > { %6600 = vmatmul.msk.f32.vlgmr.msra.gmra.mxu3 %vm440_vm0, %v7211_v50  ;;  %6599 = vmatmul.msk.f32.vlgmr.msra.gmra.mxu2 %vm440_vm0, %v7211_v50  ;;  %v2561_v9 = vpop.f32.mrf.mxu1  ;;  %v2541_v10 = vpop.f32.mrf.mxu0 }
 0x162   : > { %v5872_v11 = vrot.slane %v2561_v9, 4  ;;  %4039 = vmatpush.msra.mxu3 %v363_v7  ;;  %4019 = vmatpush.msra.mxu2 %v362_v8  ;;  %v381_v9 = vld [vmem:[%s6778_s16 + $0x628] sm:$0xff] }
 0x164   : > { %v2601_v14 = vpop.f32.mrf.mxu3  ;;  %v6001_v15 = vsel %vm5948_vm1, %v2541_v10, %v5872_v11  ;;  %v2581_v16 = vpop.f32.mrf.mxu2  ;;  %6598 = vmatmul.msk.f32.vlgmr.msra.gmra.mxu1 %vm440_vm0, %v7211_v50  ;;  %6597 = vmatmul.msk.f32.vlgmr.msra.gmra.mxu0 %vm440_vm0, %v7211_v50  ;;  %v380_v10 = vld [vmem:[%s6778_s16 + $0x620] sm:$0xff] }
 0x165   : > { %v5873_v17 = vrot.slane %v2601_v14, 4  ;;  %6257 = vst [vmem:[%s6995_s22 + $0x1a0] sm:$0xff] %v6001_v15  ;;  %3999 = vmatpush.msra.mxu1 %v361_v12  ;;  %3979 = vmatpush.msra.mxu0 %v360_v13 }
 0x167   : > { %v6002_v18 = vsel %vm5948_vm1, %v2581_v16, %v5873_v17  ;;  %v387_v16 = vld [vmem:[%s6778_s16 + $0x658] sm:$0xff]  ;;  %v386_v17 = vld [vmem:[%s6778_s16 + $0x650] sm:$0xff] }
 0x168   : > { %6258 = vst [vmem:[%s6995_s22 + $0x1a8] sm:$0xff] %v6002_v18 }
 0x169   : > { %6604 = vmatmul.msk.f32.vlgmr.msrb.gmra.mxu3 %vm440_vm0, %v7211_v50  ;;  %6603 = vmatmul.msk.f32.vlgmr.msrb.gmra.mxu2 %vm440_vm0, %v7211_v50  ;;  %v2641_v21 = vpop.f32.mrf.mxu1  ;;  %v2621_v22 = vpop.f32.mrf.mxu0 }
 0x16a   : > { %v5874_v23 = vrot.slane %v2641_v21, 4  ;;  %4119 = vmatpush.msrb.mxu3 %v367_v19  ;;  %4099 = vmatpush.msrb.mxu2 %v366_v20  ;;  %v385_v21 = vld [vmem:[%s6778_s16 + $0x648] sm:$0xff] }
 0x16c   : > { %v2681_v26 = vpop.f32.mrf.mxu3  ;;  %v6003_v27 = vsel %vm5948_vm1, %v2621_v22, %v5874_v23  ;;  %v2661_v28 = vpop.f32.mrf.mxu2  ;;  %6602 = vmatmul.msk.f32.vlgmr.msrb.gmra.mxu1 %vm440_vm0, %v7211_v50  ;;  %6601 = vmatmul.msk.f32.vlgmr.msrb.gmra.mxu0 %vm440_vm0, %v7211_v50  ;;  %v384_v22 = vld [vmem:[%s6778_s16 + $0x640] sm:$0xff] }
 0x16d   : > { %v5875_v29 = vrot.slane %v2681_v26, 4  ;;  %6259 = vst [vmem:[%s6995_s22 + $0x1b0] sm:$0xff] %v6003_v27  ;;  %4079 = vmatpush.msrb.mxu1 %v365_v24  ;;  %4059 = vmatpush.msrb.mxu0 %v364_v25 }
 0x16f   : > { %v6004_v30 = vsel %vm5948_vm1, %v2661_v28, %v5875_v29  ;;  %v391_v28 = vld [vmem:[%s6778_s16 + $0x678] sm:$0xff]  ;;  %v390_v29 = vld [vmem:[%s6778_s16 + $0x670] sm:$0xff] }
 0x170   : > { %6260 = vst [vmem:[%s6995_s22 + $0x1b8] sm:$0xff] %v6004_v30 }
 0x171   : > { %6608 = vmatmul.msk.f32.vlgmr.msra.gmra.mxu3 %vm440_vm0, %v7211_v50  ;;  %6607 = vmatmul.msk.f32.vlgmr.msra.gmra.mxu2 %vm440_vm0, %v7211_v50  ;;  %v2721_v33 = vpop.f32.mrf.mxu1  ;;  %v2701_v34 = vpop.f32.mrf.mxu0 }
 0x172   : > { %v5876_v35 = vrot.slane %v2721_v33, 4  ;;  %4199 = vmatpush.msra.mxu3 %v371_v31  ;;  %4179 = vmatpush.msra.mxu2 %v370_v32  ;;  %v389_v33 = vld [vmem:[%s6778_s16 + $0x668] sm:$0xff] }
 0x174   : > { %v2761_v38 = vpop.f32.mrf.mxu3  ;;  %v6005_v39 = vsel %vm5948_vm1, %v2701_v34, %v5876_v35  ;;  %v2741_v40 = vpop.f32.mrf.mxu2  ;;  %6606 = vmatmul.msk.f32.vlgmr.msra.gmra.mxu1 %vm440_vm0, %v7211_v50  ;;  %6605 = vmatmul.msk.f32.vlgmr.msra.gmra.mxu0 %vm440_vm0, %v7211_v50  ;;  %v388_v34 = vld [vmem:[%s6778_s16 + $0x660] sm:$0xff] }
 0x175   : > { %v5877_v41 = vrot.slane %v2761_v38, 4  ;;  %6261 = vst [vmem:[%s6995_s22 + $0x1c0] sm:$0xff] %v6005_v39  ;;  %4159 = vmatpush.msra.mxu1 %v369_v36  ;;  %4139 = vmatpush.msra.mxu0 %v368_v37 }
 0x177   : > { %v6006_v42 = vsel %vm5948_vm1, %v2741_v40, %v5877_v41  ;;  %v395_v40 = vld [vmem:[%s6778_s16 + $0x698] sm:$0xff]  ;;  %v394_v41 = vld [vmem:[%s6778_s16 + $0x690] sm:$0xff] }
 0x178   : > { %6262 = vst [vmem:[%s6995_s22 + $0x1c8] sm:$0xff] %v6006_v42 }
 0x179   : > { %6612 = vmatmul.msk.f32.vlgmr.msrb.gmra.mxu3 %vm440_vm0, %v7211_v50  ;;  %6611 = vmatmul.msk.f32.vlgmr.msrb.gmra.mxu2 %vm440_vm0, %v7211_v50  ;;  %v2801_v45 = vpop.f32.mrf.mxu1  ;;  %v2781_v46 = vpop.f32.mrf.mxu0 }
 0x17a   : > { %v5878_v47 = vrot.slane %v2801_v45, 4  ;;  %4279 = vmatpush.msrb.mxu3 %v375_v43  ;;  %4259 = vmatpush.msrb.mxu2 %v374_v44  ;;  %v393_v45 = vld [vmem:[%s6778_s16 + $0x688] sm:$0xff] }
 0x17c   : > { %v2841_v0 = vpop.f32.mrf.mxu3  ;;  %v6007_v51 = vsel %vm5948_vm1, %v2781_v46, %v5878_v47  ;;  %v2821_v52 = vpop.f32.mrf.mxu2  ;;  %6610 = vmatmul.msk.f32.vlgmr.msrb.gmra.mxu1 %vm440_vm0, %v7211_v50  ;;  %6609 = vmatmul.msk.f32.vlgmr.msrb.gmra.mxu0 %vm440_vm0, %v7211_v50  ;;  %v392_v46 = vld [vmem:[%s6778_s16 + $0x680] sm:$0xff] }
 0x17d   : > { %v5879_v53 = vrot.slane %v2841_v0, 4  ;;  %6263 = vst [vmem:[%s6995_s22 + $0x1d0] sm:$0xff] %v6007_v51  ;;  %4239 = vmatpush.msrb.mxu1 %v373_v48  ;;  %4219 = vmatpush.msrb.mxu0 %v372_v49 }
 0x17f   : > { %v6008_v54 = vsel %vm5948_vm1, %v2821_v52, %v5879_v53  ;;  %v399_v52 = vld [vmem:[%s6778_s16 + $0x6b8] sm:$0xff]  ;;  %v398_v53 = vld [vmem:[%s6778_s16 + $0x6b0] sm:$0xff] }
 0x180   : > { %6264 = vst [vmem:[%s6995_s22 + $0x1d8] sm:$0xff] %v6008_v54 }
 0x181   : > { %6616 = vmatmul.msk.f32.vlgmr.msra.gmra.mxu3 %vm440_vm0, %v7211_v50  ;;  %6615 = vmatmul.msk.f32.vlgmr.msra.gmra.mxu2 %vm440_vm0, %v7211_v50  ;;  %v2881_v57 = vpop.f32.mrf.mxu1  ;;  %v2861_v58 = vpop.f32.mrf.mxu0 }
 0x182   : > { %v5880_v59 = vrot.slane %v2881_v57, 4  ;;  %4359 = vmatpush.msra.mxu3 %v379_v55  ;;  %4339 = vmatpush.msra.mxu2 %v378_v56  ;;  %v397_v57 = vld [vmem:[%s6778_s16 + $0x6a8] sm:$0xff] }
 0x184   : > { %v2921_v62 = vpop.f32.mrf.mxu3  ;;  %v6009_v63 = vsel %vm5948_vm1, %v2861_v58, %v5880_v59  ;;  %v2901_v1 = vpop.f32.mrf.mxu2  ;;  %6614 = vmatmul.msk.f32.vlgmr.msra.gmra.mxu1 %vm440_vm0, %v7211_v50  ;;  %6613 = vmatmul.msk.f32.vlgmr.msra.gmra.mxu0 %vm440_vm0, %v7211_v50  ;;  %v396_v58 = vld [vmem:[%s6778_s16 + $0x6a0] sm:$0xff] }
 0x185   : > { %v5881_v2 = vrot.slane %v2921_v62, 4  ;;  %6265 = vst [vmem:[%s6995_s22 + $0x1e0] sm:$0xff] %v6009_v63  ;;  %4319 = vmatpush.msra.mxu1 %v377_v60  ;;  %4299 = vmatpush.msra.mxu0 %v376_v61 }
 0x187   : > { %v6010_v3 = vsel %vm5948_vm1, %v2901_v1, %v5881_v2  ;;  %v403_v1 = vld [vmem:[%s6778_s16 + $0x6d8] sm:$0xff]  ;;  %v402_v2 = vld [vmem:[%s6778_s16 + $0x6d0] sm:$0xff] }
 0x188   : > { %6266 = vst [vmem:[%s6995_s22 + $0x1e8] sm:$0xff] %v6010_v3 }
 0x189   : > { %6620 = vmatmul.msk.f32.vlgmr.msrb.gmra.mxu3 %vm440_vm0, %v7211_v50  ;;  %6619 = vmatmul.msk.f32.vlgmr.msrb.gmra.mxu2 %vm440_vm0, %v7211_v50  ;;  %v2961_v6 = vpop.f32.mrf.mxu1  ;;  %v2941_v7 = vpop.f32.mrf.mxu0 }
 0x18a   : > { %v5882_v8 = vrot.slane %v2961_v6, 4  ;;  %4439 = vmatpush.msrb.mxu3 %v383_v4  ;;  %4419 = vmatpush.msrb.mxu2 %v382_v5  ;;  %v401_v6 = vld [vmem:[%s6778_s16 + $0x6c8] sm:$0xff] }
 0x18c   : > { %v3001_v11 = vpop.f32.mrf.mxu3  ;;  %v6011_v12 = vsel %vm5948_vm1, %v2941_v7, %v5882_v8  ;;  %v2981_v13 = vpop.f32.mrf.mxu2  ;;  %6618 = vmatmul.msk.f32.vlgmr.msrb.gmra.mxu1 %vm440_vm0, %v7211_v50  ;;  %6617 = vmatmul.msk.f32.vlgmr.msrb.gmra.mxu0 %vm440_vm0, %v7211_v50  ;;  %v400_v7 = vld [vmem:[%s6778_s16 + $0x6c0] sm:$0xff] }
 0x18d   : > { %v5883_v14 = vrot.slane %v3001_v11, 4  ;;  %6267 = vst [vmem:[%s6995_s22 + $0x1f0] sm:$0xff] %v6011_v12  ;;  %4399 = vmatpush.msrb.mxu1 %v381_v9  ;;  %4379 = vmatpush.msrb.mxu0 %v380_v10 }
 0x18f   : > { %v6012_v15 = vsel %vm5948_vm1, %v2981_v13, %v5883_v14  ;;  %v407_v13 = vld [vmem:[%s6778_s16 + $0x6f8] sm:$0xff]  ;;  %v406_v14 = vld [vmem:[%s6778_s16 + $0x6f0] sm:$0xff] }
 0x190   : > { %6268 = vst [vmem:[%s6995_s22 + $0x1f8] sm:$0xff] %v6012_v15  ;;  %v7593_v15 = vld [vmem:[%s7835_s1] sm:$0xf] }
 0x191   : > { %6624 = vmatmul.msk.f32.vlgmr.msra.gmra.mxu3 %vm440_vm0, %v7211_v50  ;;  %6623 = vmatmul.msk.f32.vlgmr.msra.gmra.mxu2 %vm440_vm0, %v7211_v50  ;;  %v3041_v18 = vpop.f32.mrf.mxu1  ;;  %v3021_v19 = vpop.f32.mrf.mxu0 }
 0x192   : > { %v5884_v20 = vrot.slane %v3041_v18, 4  ;;  %4519 = vmatpush.msra.mxu3 %v387_v16  ;;  %4499 = vmatpush.msra.mxu2 %v386_v17  ;;  %v405_v18 = vld [vmem:[%s6778_s16 + $0x6e8] sm:$0xff] }
 0x194   : > { %v3081_v23 = vpop.f32.mrf.mxu3  ;;  %v6013_v24 = vsel %vm5948_vm1, %v3021_v19, %v5884_v20  ;;  %v3061_v25 = vpop.f32.mrf.mxu2  ;;  %6622 = vmatmul.msk.f32.vlgmr.msra.gmra.mxu1 %vm440_vm0, %v7211_v50  ;;  %6621 = vmatmul.msk.f32.vlgmr.msra.gmra.mxu0 %vm440_vm0, %v7211_v50  ;;  %v404_v19 = vld [vmem:[%s6778_s16 + $0x6e0] sm:$0xff] }
 0x195   : > { %v5885_v26 = vrot.slane %v3081_v23, 4  ;;  %6269 = vst [vmem:[%s6995_s22 + $0x200] sm:$0xff] %v6013_v24  ;;  %4479 = vmatpush.msra.mxu1 %v385_v21  ;;  %4459 = vmatpush.msra.mxu0 %v384_v22 }
 0x197   : > { %v6014_v27 = vsel %vm5948_vm1, %v3061_v25, %v5885_v26  ;;  %v411_v25 = vld [vmem:[%s6778_s16 + $0x718] sm:$0xff]  ;;  %v410_v26 = vld [vmem:[%s6778_s16 + $0x710] sm:$0xff] }
 0x198   : > { %6270 = vst [vmem:[%s6995_s22 + $0x208] sm:$0xff] %v6014_v27 }
 0x199   : > { %6628 = vmatmul.msk.f32.vlgmr.msrb.gmra.mxu3 %vm440_vm0, %v7211_v50  ;;  %6627 = vmatmul.msk.f32.vlgmr.msrb.gmra.mxu2 %vm440_vm0, %v7211_v50  ;;  %v3121_v30 = vpop.f32.mrf.mxu1  ;;  %v3101_v31 = vpop.f32.mrf.mxu0 }
 0x19a   : > { %v5886_v32 = vrot.slane %v3121_v30, 4  ;;  %4599 = vmatpush.msrb.mxu3 %v391_v28  ;;  %4579 = vmatpush.msrb.mxu2 %v390_v29  ;;  %v409_v30 = vld [vmem:[%s6778_s16 + $0x708] sm:$0xff] }
 0x19c   : > { %v3161_v35 = vpop.f32.mrf.mxu3  ;;  %v6015_v36 = vsel %vm5948_vm1, %v3101_v31, %v5886_v32  ;;  %v3141_v37 = vpop.f32.mrf.mxu2  ;;  %6626 = vmatmul.msk.f32.vlgmr.msrb.gmra.mxu1 %vm440_vm0, %v7211_v50  ;;  %6625 = vmatmul.msk.f32.vlgmr.msrb.gmra.mxu0 %vm440_vm0, %v7211_v50  ;;  %v408_v31 = vld [vmem:[%s6778_s16 + $0x700] sm:$0xff] }
 0x19d   : > { %v5887_v38 = vrot.slane %v3161_v35, 4  ;;  %6271 = vst [vmem:[%s6995_s22 + $0x210] sm:$0xff] %v6015_v36  ;;  %4559 = vmatpush.msrb.mxu1 %v389_v33  ;;  %4539 = vmatpush.msrb.mxu0 %v388_v34 }
 0x19f   : > { %v6016_v39 = vsel %vm5948_vm1, %v3141_v37, %v5887_v38  ;;  %v415_v37 = vld [vmem:[%s6778_s16 + $0x738] sm:$0xff]  ;;  %v414_v38 = vld [vmem:[%s6778_s16 + $0x730] sm:$0xff] }
 0x1a0   : > { %6272 = vst [vmem:[%s6995_s22 + $0x218] sm:$0xff] %v6016_v39 }
 0x1a1   : > { %6632 = vmatmul.msk.f32.vlgmr.msra.gmra.mxu3 %vm440_vm0, %v7211_v50  ;;  %6631 = vmatmul.msk.f32.vlgmr.msra.gmra.mxu2 %vm440_vm0, %v7211_v50  ;;  %v3201_v42 = vpop.f32.mrf.mxu1  ;;  %v3181_v43 = vpop.f32.mrf.mxu0 }
 0x1a2   : > { %v5888_v44 = vrot.slane %v3201_v42, 4  ;;  %4679 = vmatpush.msra.mxu3 %v395_v40  ;;  %4659 = vmatpush.msra.mxu2 %v394_v41  ;;  %v413_v42 = vld [vmem:[%s6778_s16 + $0x728] sm:$0xff] }
 0x1a4   : > { %v3241_v47 = vpop.f32.mrf.mxu3  ;;  %v6017_v48 = vsel %vm5948_vm1, %v3181_v43, %v5888_v44  ;;  %v3221_v49 = vpop.f32.mrf.mxu2  ;;  %6630 = vmatmul.msk.f32.vlgmr.msra.gmra.mxu1 %vm440_vm0, %v7211_v50  ;;  %6629 = vmatmul.msk.f32.vlgmr.msra.gmra.mxu0 %vm440_vm0, %v7211_v50  ;;  %v412_v43 = vld [vmem:[%s6778_s16 + $0x720] sm:$0xff] }
 0x1a5   : > { %v5889_v0 = vrot.slane %v3241_v47, 4  ;;  %6273 = vst [vmem:[%s6995_s22 + $0x220] sm:$0xff] %v6017_v48  ;;  %4639 = vmatpush.msra.mxu1 %v393_v45  ;;  %4619 = vmatpush.msra.mxu0 %v392_v46 }
 0x1a7   : > { %v6018_v51 = vsel %vm5948_vm1, %v3221_v49, %v5889_v0  ;;  %v419_v49 = vld [vmem:[%s6778_s16 + $0x758] sm:$0xff]  ;;  %v418_v0 = vld [vmem:[%s6778_s16 + $0x750] sm:$0xff] }
 0x1a8   : > { %6274 = vst [vmem:[%s6995_s22 + $0x228] sm:$0xff] %v6018_v51 }
 0x1a9   : > { %6636 = vmatmul.msk.f32.vlgmr.msrb.gmra.mxu3 %vm440_vm0, %v7211_v50  ;;  %6635 = vmatmul.msk.f32.vlgmr.msrb.gmra.mxu2 %vm440_vm0, %v7211_v50  ;;  %v3281_v54 = vpop.f32.mrf.mxu1  ;;  %v3261_v55 = vpop.f32.mrf.mxu0 }
 0x1aa   : > { %v5890_v56 = vrot.slane %v3281_v54, 4  ;;  %4759 = vmatpush.msrb.mxu3 %v399_v52  ;;  %4739 = vmatpush.msrb.mxu2 %v398_v53  ;;  %v417_v54 = vld [vmem:[%s6778_s16 + $0x748] sm:$0xff] }
 0x1ac   : > { %v3321_v59 = vpop.f32.mrf.mxu3  ;;  %v6019_v60 = vsel %vm5948_vm1, %v3261_v55, %v5890_v56  ;;  %v3301_v61 = vpop.f32.mrf.mxu2  ;;  %6634 = vmatmul.msk.f32.vlgmr.msrb.gmra.mxu1 %vm440_vm0, %v7211_v50  ;;  %6633 = vmatmul.msk.f32.vlgmr.msrb.gmra.mxu0 %vm440_vm0, %v7211_v50  ;;  %v416_v55 = vld [vmem:[%s6778_s16 + $0x740] sm:$0xff] }
 0x1ad   : > { %v5891_v62 = vrot.slane %v3321_v59, 4  ;;  %6275 = vst [vmem:[%s6995_s22 + $0x230] sm:$0xff] %v6019_v60  ;;  %4719 = vmatpush.msrb.mxu1 %v397_v57  ;;  %4699 = vmatpush.msrb.mxu0 %v396_v58 }
 0x1af   : > { %v6020_v63 = vsel %vm5948_vm1, %v3301_v61, %v5891_v62  ;;  %v423_v61 = vld [vmem:[%s6778_s16 + $0x778] sm:$0xff]  ;;  %v422_v62 = vld [vmem:[%s6778_s16 + $0x770] sm:$0xff] }
 0x1b0   : > { %6276 = vst [vmem:[%s6995_s22 + $0x238] sm:$0xff] %v6020_v63 }
 0x1b1   : > { %6640 = vmatmul.msk.f32.vlgmr.msra.gmra.mxu3 %vm440_vm0, %v7211_v50  ;;  %6639 = vmatmul.msk.f32.vlgmr.msra.gmra.mxu2 %vm440_vm0, %v7211_v50  ;;  %v3361_v3 = vpop.f32.mrf.mxu1  ;;  %v3341_v4 = vpop.f32.mrf.mxu0 }
 0x1b2   : > { %v5892_v5 = vrot.slane %v3361_v3, 4  ;;  %4839 = vmatpush.msra.mxu3 %v403_v1  ;;  %4819 = vmatpush.msra.mxu2 %v402_v2  ;;  %v421_v3 = vld [vmem:[%s6778_s16 + $0x768] sm:$0xff] }
 0x1b4   : > { %v3401_v8 = vpop.f32.mrf.mxu3  ;;  %v6021_v9 = vsel %vm5948_vm1, %v3341_v4, %v5892_v5  ;;  %v3381_v10 = vpop.f32.mrf.mxu2  ;;  %6638 = vmatmul.msk.f32.vlgmr.msra.gmra.mxu1 %vm440_vm0, %v7211_v50  ;;  %6637 = vmatmul.msk.f32.vlgmr.msra.gmra.mxu0 %vm440_vm0, %v7211_v50  ;;  %v420_v4 = vld [vmem:[%s6778_s16 + $0x760] sm:$0xff] }
 0x1b5   : > { %v5893_v11 = vrot.slane %v3401_v8, 4  ;;  %6277 = vst [vmem:[%s6995_s22 + $0x240] sm:$0xff] %v6021_v9  ;;  %4799 = vmatpush.msra.mxu1 %v401_v6  ;;  %4779 = vmatpush.msra.mxu0 %v400_v7 }
 0x1b7   : > { %v6022_v12 = vsel %vm5948_vm1, %v3381_v10, %v5893_v11  ;;  %v427_v10 = vld [vmem:[%s6778_s16 + $0x798] sm:$0xff]  ;;  %v426_v11 = vld [vmem:[%s6778_s16 + $0x790] sm:$0xff] }
 0x1b8   : > { %6278 = vst [vmem:[%s6995_s22 + $0x248] sm:$0xff] %v6022_v12 }
 0x1b9   : > { %6644 = vmatmul.msk.f32.vlgmr.msrb.gmra.mxu3 %vm440_vm0, %v7593_v15  ;;  %6643 = vmatmul.msk.f32.vlgmr.msrb.gmra.mxu2 %vm440_vm0, %v7593_v15  ;;  %v3441_v50 = vpop.f32.mrf.mxu1  ;;  %v3421_v16 = vpop.f32.mrf.mxu0 }
 0x1ba   : > { %v5894_v17 = vrot.slane %v3441_v50, 4  ;;  %4919 = vmatpush.msrb.mxu3 %v407_v13  ;;  %4899 = vmatpush.msrb.mxu2 %v406_v14  ;;  %v425_v50 = vld [vmem:[%s6778_s16 + $0x788] sm:$0xff] }
 0x1bc   : > { %v3481_v20 = vpop.f32.mrf.mxu3  ;;  %v6023_v21 = vsel %vm5948_vm1, %v3421_v16, %v5894_v17  ;;  %v3461_v22 = vpop.f32.mrf.mxu2  ;;  %6642 = vmatmul.msk.f32.vlgmr.msrb.gmra.mxu1 %vm440_vm0, %v7593_v15  ;;  %6641 = vmatmul.msk.f32.vlgmr.msrb.gmra.mxu0 %vm440_vm0, %v7593_v15  ;;  %v424_v16 = vld [vmem:[%s6778_s16 + $0x780] sm:$0xff] }
 0x1bd   : > { %v5895_v23 = vrot.slane %v3481_v20, 4  ;;  %6279 = vst [vmem:[%s6995_s22 + $0x250] sm:$0xff] %v6023_v21  ;;  %4879 = vmatpush.msrb.mxu1 %v405_v18  ;;  %4859 = vmatpush.msrb.mxu0 %v404_v19 }
 0x1bf   : > { %v6024_v24 = vsel %vm5948_vm1, %v3461_v22, %v5895_v23  ;;  %v431_v22 = vld [vmem:[%s6778_s16 + $0x7b8] sm:$0xff]  ;;  %v430_v23 = vld [vmem:[%s6778_s16 + $0x7b0] sm:$0xff] }
 0x1c0   : > { %6280 = vst [vmem:[%s6995_s22 + $0x258] sm:$0xff] %v6024_v24 }
 0x1c1   : > { %6648 = vmatmul.msk.f32.vlgmr.msra.gmra.mxu3 %vm440_vm0, %v7593_v15  ;;  %6647 = vmatmul.msk.f32.vlgmr.msra.gmra.mxu2 %vm440_vm0, %v7593_v15  ;;  %v3521_v27 = vpop.f32.mrf.mxu1  ;;  %v3501_v28 = vpop.f32.mrf.mxu0 }
 0x1c2   : > { %v5896_v29 = vrot.slane %v3521_v27, 4  ;;  %4999 = vmatpush.msra.mxu3 %v411_v25  ;;  %4979 = vmatpush.msra.mxu2 %v410_v26  ;;  %v429_v27 = vld [vmem:[%s6778_s16 + $0x7a8] sm:$0xff] }
 0x1c4   : > { %v3561_v32 = vpop.f32.mrf.mxu3  ;;  %v6025_v33 = vsel %vm5948_vm1, %v3501_v28, %v5896_v29  ;;  %v3541_v34 = vpop.f32.mrf.mxu2  ;;  %6646 = vmatmul.msk.f32.vlgmr.msra.gmra.mxu1 %vm440_vm0, %v7593_v15  ;;  %6645 = vmatmul.msk.f32.vlgmr.msra.gmra.mxu0 %vm440_vm0, %v7593_v15  ;;  %v428_v28 = vld [vmem:[%s6778_s16 + $0x7a0] sm:$0xff] }
 0x1c5   : > { %v5897_v35 = vrot.slane %v3561_v32, 4  ;;  %6281 = vst [vmem:[%s6995_s22 + $0x260] sm:$0xff] %v6025_v33  ;;  %4959 = vmatpush.msra.mxu1 %v409_v30  ;;  %4939 = vmatpush.msra.mxu0 %v408_v31 }
 0x1c7   : > { %v6026_v36 = vsel %vm5948_vm1, %v3541_v34, %v5897_v35  ;;  %v435_v34 = vld [vmem:[%s6778_s16 + $0x7d8] sm:$0xff]  ;;  %v434_v35 = vld [vmem:[%s6778_s16 + $0x7d0] sm:$0xff] }
 0x1c8   : > { %6282 = vst [vmem:[%s6995_s22 + $0x268] sm:$0xff] %v6026_v36 }
 0x1c9   : > { %6652 = vmatmul.msk.f32.vlgmr.msrb.gmra.mxu3 %vm440_vm0, %v7593_v15  ;;  %6651 = vmatmul.msk.f32.vlgmr.msrb.gmra.mxu2 %vm440_vm0, %v7593_v15  ;;  %v3601_v39 = vpop.f32.mrf.mxu1  ;;  %v3581_v40 = vpop.f32.mrf.mxu0 }
 0x1ca   : > { %v5898_v41 = vrot.slane %v3601_v39, 4  ;;  %5079 = vmatpush.msrb.mxu3 %v415_v37  ;;  %5059 = vmatpush.msrb.mxu2 %v414_v38  ;;  %v433_v39 = vld [vmem:[%s6778_s16 + $0x7c8] sm:$0xff] }
 0x1cc   : > { %v3641_v44 = vpop.f32.mrf.mxu3  ;;  %v6027_v45 = vsel %vm5948_vm1, %v3581_v40, %v5898_v41  ;;  %v3621_v46 = vpop.f32.mrf.mxu2  ;;  %6650 = vmatmul.msk.f32.vlgmr.msrb.gmra.mxu1 %vm440_vm0, %v7593_v15  ;;  %6649 = vmatmul.msk.f32.vlgmr.msrb.gmra.mxu0 %vm440_vm0, %v7593_v15  ;;  %v432_v40 = vld [vmem:[%s6778_s16 + $0x7c0] sm:$0xff] }
 0x1cd   : > { %v5899_v47 = vrot.slane %v3641_v44, 4  ;;  %6283 = vst [vmem:[%s6995_s22 + $0x270] sm:$0xff] %v6027_v45  ;;  %5039 = vmatpush.msrb.mxu1 %v413_v42  ;;  %5019 = vmatpush.msrb.mxu0 %v412_v43 }
 0x1cf   : > { %v6028_v48 = vsel %vm5948_vm1, %v3621_v46, %v5899_v47  ;;  %v439_v46 = vld [vmem:[%s6778_s16 + $0x7f8] sm:$0xff]  ;;  %v438_v47 = vld [vmem:[%s6778_s16 + $0x7f0] sm:$0xff] }
 0x1d0   : > { %6284 = vst [vmem:[%s6995_s22 + $0x278] sm:$0xff] %v6028_v48 }
 0x1d1   : > { %6656 = vmatmul.msk.f32.vlgmr.msra.gmra.mxu3 %vm440_vm0, %v7593_v15  ;;  %6655 = vmatmul.msk.f32.vlgmr.msra.gmra.mxu2 %vm440_vm0, %v7593_v15  ;;  %v3681_v51 = vpop.f32.mrf.mxu1  ;;  %v3661_v52 = vpop.f32.mrf.mxu0 }
 0x1d2   : > { %v5900_v53 = vrot.slane %v3681_v51, 4  ;;  %5159 = vmatpush.msra.mxu3 %v419_v49  ;;  %5139 = vmatpush.msra.mxu2 %v418_v0  ;;  %v437_v51 = vld [vmem:[%s6778_s16 + $0x7e8] sm:$0xff] }
 0x1d4   : > { %v3721_v56 = vpop.f32.mrf.mxu3  ;;  %v6029_v57 = vsel %vm5948_vm1, %v3661_v52, %v5900_v53  ;;  %v3701_v58 = vpop.f32.mrf.mxu2  ;;  %6654 = vmatmul.msk.f32.vlgmr.msra.gmra.mxu1 %vm440_vm0, %v7593_v15  ;;  %6653 = vmatmul.msk.f32.vlgmr.msra.gmra.mxu0 %vm440_vm0, %v7593_v15  ;;  %v436_v52 = vld [vmem:[%s6778_s16 + $0x7e0] sm:$0xff] }
 0x1d5   : > { %v5901_v59 = vrot.slane %v3721_v56, 4  ;;  %6285 = vst [vmem:[%s6995_s22 + $0x280] sm:$0xff] %v6029_v57  ;;  %5119 = vmatpush.msra.mxu1 %v417_v54  ;;  %5099 = vmatpush.msra.mxu0 %v416_v55 }
 0x1d7   : > { %v6030_v60 = vsel %vm5948_vm1, %v3701_v58, %v5901_v59 }
 0x1d8   : > { %6286 = vst [vmem:[%s6995_s22 + $0x288] sm:$0xff] %v6030_v60 }
 0x1d9   : > { %6660 = vmatmul.msk.f32.vlgmr.msrb.gmra.mxu3 %vm440_vm0, %v7593_v15  ;;  %6659 = vmatmul.msk.f32.vlgmr.msrb.gmra.mxu2 %vm440_vm0, %v7593_v15  ;;  %v3761_v63 = vpop.f32.mrf.mxu1  ;;  %v3741_v1 = vpop.f32.mrf.mxu0 }
 0x1da   : > { %v5902_v2 = vrot.slane %v3761_v63, 4  ;;  %5239 = vmatpush.msrb.mxu3 %v423_v61  ;;  %5219 = vmatpush.msrb.mxu2 %v422_v62 }
 0x1dc   : > { %v3801_v5 = vpop.f32.mrf.mxu3  ;;  %v6031_v6 = vsel %vm5948_vm1, %v3741_v1, %v5902_v2  ;;  %v3781_v7 = vpop.f32.mrf.mxu2  ;;  %6658 = vmatmul.msk.f32.vlgmr.msrb.gmra.mxu1 %vm440_vm0, %v7593_v15  ;;  %6657 = vmatmul.msk.f32.vlgmr.msrb.gmra.mxu0 %vm440_vm0, %v7593_v15 }
 0x1dd   : > { %v5903_v8 = vrot.slane %v3801_v5, 4  ;;  %6287 = vst [vmem:[%s6995_s22 + $0x290] sm:$0xff] %v6031_v6  ;;  %5199 = vmatpush.msrb.mxu1 %v421_v3  ;;  %5179 = vmatpush.msrb.mxu0 %v420_v4 }
 0x1df   : > { %v6032_v9 = vsel %vm5948_vm1, %v3781_v7, %v5903_v8 }
 0x1e0   : > { %6288 = vst [vmem:[%s6995_s22 + $0x298] sm:$0xff] %v6032_v9 }
 0x1e1   : > { %6664 = vmatmul.msk.f32.vlgmr.msra.gmra.mxu3 %vm440_vm0, %v7593_v15  ;;  %6663 = vmatmul.msk.f32.vlgmr.msra.gmra.mxu2 %vm440_vm0, %v7593_v15  ;;  %v3841_v12 = vpop.f32.mrf.mxu1  ;;  %v3821_v13 = vpop.f32.mrf.mxu0 }
 0x1e2   : > { %v5904_v14 = vrot.slane %v3841_v12, 4  ;;  %5319 = vmatpush.msra.mxu3 %v427_v10  ;;  %5299 = vmatpush.msra.mxu2 %v426_v11 }
 0x1e4   : > { %v3881_v17 = vpop.f32.mrf.mxu3  ;;  %v6033_v18 = vsel %vm5948_vm1, %v3821_v13, %v5904_v14  ;;  %v3861_v19 = vpop.f32.mrf.mxu2  ;;  %6662 = vmatmul.msk.f32.vlgmr.msra.gmra.mxu1 %vm440_vm0, %v7593_v15  ;;  %6661 = vmatmul.msk.f32.vlgmr.msra.gmra.mxu0 %vm440_vm0, %v7593_v15 }
 0x1e5   : > { %v5905_v20 = vrot.slane %v3881_v17, 4  ;;  %6289 = vst [vmem:[%s6995_s22 + $0x2a0] sm:$0xff] %v6033_v18  ;;  %5279 = vmatpush.msra.mxu1 %v425_v50  ;;  %5259 = vmatpush.msra.mxu0 %v424_v16 }
 0x1e7   : > { %v6034_v21 = vsel %vm5948_vm1, %v3861_v19, %v5905_v20 }
 0x1e8   : > { %6290 = vst [vmem:[%s6995_s22 + $0x2a8] sm:$0xff] %v6034_v21 }
 0x1e9   : > { %6668 = vmatmul.msk.f32.vlgmr.msrb.gmra.mxu3 %vm440_vm0, %v7593_v15  ;;  %6667 = vmatmul.msk.f32.vlgmr.msrb.gmra.mxu2 %vm440_vm0, %v7593_v15  ;;  %v3921_v24 = vpop.f32.mrf.mxu1  ;;  %v3901_v25 = vpop.f32.mrf.mxu0 }
 0x1ea   : > { %v5906_v26 = vrot.slane %v3921_v24, 4  ;;  %5399 = vmatpush.msrb.mxu3 %v431_v22  ;;  %5379 = vmatpush.msrb.mxu2 %v430_v23 }
 0x1ec   : > { %v3961_v29 = vpop.f32.mrf.mxu3  ;;  %v6035_v30 = vsel %vm5948_vm1, %v3901_v25, %v5906_v26  ;;  %v3941_v31 = vpop.f32.mrf.mxu2  ;;  %6666 = vmatmul.msk.f32.vlgmr.msrb.gmra.mxu1 %vm440_vm0, %v7593_v15  ;;  %6665 = vmatmul.msk.f32.vlgmr.msrb.gmra.mxu0 %vm440_vm0, %v7593_v15 }
 0x1ed   : > { %v5907_v32 = vrot.slane %v3961_v29, 4  ;;  %6291 = vst [vmem:[%s6995_s22 + $0x2b0] sm:$0xff] %v6035_v30  ;;  %5359 = vmatpush.msrb.mxu1 %v429_v27  ;;  %5339 = vmatpush.msrb.mxu0 %v428_v28 }
 0x1ef   : > { %v6036_v33 = vsel %vm5948_vm1, %v3941_v31, %v5907_v32 }
 0x1f0   : > { %6292 = vst [vmem:[%s6995_s22 + $0x2b8] sm:$0xff] %v6036_v33 }
 0x1f1   : > { %6672 = vmatmul.msk.f32.vlgmr.msra.gmra.mxu3 %vm440_vm0, %v7593_v15  ;;  %6671 = vmatmul.msk.f32.vlgmr.msra.gmra.mxu2 %vm440_vm0, %v7593_v15  ;;  %v4001_v36 = vpop.f32.mrf.mxu1  ;;  %v3981_v37 = vpop.f32.mrf.mxu0 }
 0x1f2   : > { %v5908_v38 = vrot.slane %v4001_v36, 4  ;;  %5479 = vmatpush.msra.mxu3 %v435_v34  ;;  %5459 = vmatpush.msra.mxu2 %v434_v35 }
 0x1f4   : > { %v4041_v41 = vpop.f32.mrf.mxu3  ;;  %v6037_v42 = vsel %vm5948_vm1, %v3981_v37, %v5908_v38  ;;  %v4021_v43 = vpop.f32.mrf.mxu2  ;;  %6670 = vmatmul.msk.f32.vlgmr.msra.gmra.mxu1 %vm440_vm0, %v7593_v15  ;;  %6669 = vmatmul.msk.f32.vlgmr.msra.gmra.mxu0 %vm440_vm0, %v7593_v15 }
 0x1f5   : > { %v5909_v44 = vrot.slane %v4041_v41, 4  ;;  %6293 = vst [vmem:[%s6995_s22 + $0x2c0] sm:$0xff] %v6037_v42  ;;  %5439 = vmatpush.msra.mxu1 %v433_v39  ;;  %5419 = vmatpush.msra.mxu0 %v432_v40 }
 0x1f7   : > { %v6038_v45 = vsel %vm5948_vm1, %v4021_v43, %v5909_v44 }
 0x1f8   : > { %6294 = vst [vmem:[%s6995_s22 + $0x2c8] sm:$0xff] %v6038_v45 }
 0x1f9   : > { %6676 = vmatmul.msk.f32.vlgmr.msrb.gmra.mxu3 %vm440_vm0, %v7593_v15  ;;  %6675 = vmatmul.msk.f32.vlgmr.msrb.gmra.mxu2 %vm440_vm0, %v7593_v15  ;;  %v4081_v48 = vpop.f32.mrf.mxu1  ;;  %v4061_v49 = vpop.f32.mrf.mxu0 }
 0x1fa   : > { %v5910_v0 = vrot.slane %v4081_v48, 4  ;;  %5559 = vmatpush.msrb.mxu3 %v439_v46  ;;  %5539 = vmatpush.msrb.mxu2 %v438_v47 }
 0x1fc   : > { %v4121_v53 = vpop.f32.mrf.mxu3  ;;  %v6039_v54 = vsel %vm5948_vm1, %v4061_v49, %v5910_v0  ;;  %v4101_v55 = vpop.f32.mrf.mxu2  ;;  %6674 = vmatmul.msk.f32.vlgmr.msrb.gmra.mxu1 %vm440_vm0, %v7593_v15  ;;  %6673 = vmatmul.msk.f32.vlgmr.msrb.gmra.mxu0 %vm440_vm0, %v7593_v15 }
 0x1fd   : > { %v5911_v56 = vrot.slane %v4121_v53, 4  ;;  %6295 = vst [vmem:[%s6995_s22 + $0x2d0] sm:$0xff] %v6039_v54  ;;  %5519 = vmatpush.msrb.mxu1 %v437_v51  ;;  %5499 = vmatpush.msrb.mxu0 %v436_v52 }
 0x1ff   : > { %v6040_v57 = vsel %vm5948_vm1, %v4101_v55, %v5911_v56 }
 0x200   : > { %6296 = vst [vmem:[%s6995_s22 + $0x2d8] sm:$0xff] %v6040_v57 }
 0x201   : > { %6680 = vmatmul.msk.f32.vlgmr.msra.gmra.mxu3 %vm440_vm0, %v7593_v15  ;;  %6679 = vmatmul.msk.f32.vlgmr.msra.gmra.mxu2 %vm440_vm0, %v7593_v15  ;;  %v4161_v58 = vpop.f32.mrf.mxu1  ;;  %v4141_v59 = vpop.f32.mrf.mxu0 }
 0x202   : > { %v5912_v60 = vrot.slane %v4161_v58, 4 }
 0x204   : > { %v4201_v61 = vpop.f32.mrf.mxu3  ;;  %v6041_v62 = vsel %vm5948_vm1, %v4141_v59, %v5912_v60  ;;  %v4181_v63 = vpop.f32.mrf.mxu2  ;;  %6678 = vmatmul.msk.f32.vlgmr.msra.gmra.mxu1 %vm440_vm0, %v7593_v15  ;;  %6677 = vmatmul.msk.f32.vlgmr.msra.gmra.mxu0 %vm440_vm0, %v7593_v15 }
 0x205   : > { %v5913_v1 = vrot.slane %v4201_v61, 4  ;;  %6297 = vst [vmem:[%s6995_s22 + $0x2e0] sm:$0xff] %v6041_v62 }
 0x207   : > { %v6042_v2 = vsel %vm5948_vm1, %v4181_v63, %v5913_v1 }
 0x208   : > { %6298 = vst [vmem:[%s6995_s22 + $0x2e8] sm:$0xff] %v6042_v2 }
 0x209   : > { %6684 = vmatmul.msk.f32.vlgmr.msrb.gmra.mxu3 %vm440_vm0, %v7593_v15  ;;  %6683 = vmatmul.msk.f32.vlgmr.msrb.gmra.mxu2 %vm440_vm0, %v7593_v15  ;;  %v4241_v3 = vpop.f32.mrf.mxu1  ;;  %v4221_v4 = vpop.f32.mrf.mxu0 }
 0x20a   : > { %v5914_v5 = vrot.slane %v4241_v3, 4 }
 0x20c   : > { %v4281_v6 = vpop.f32.mrf.mxu3  ;;  %v6043_v7 = vsel %vm5948_vm1, %v4221_v4, %v5914_v5  ;;  %v4261_v8 = vpop.f32.mrf.mxu2  ;;  %6682 = vmatmul.msk.f32.vlgmr.msrb.gmra.mxu1 %vm440_vm0, %v7593_v15  ;;  %6681 = vmatmul.msk.f32.vlgmr.msrb.gmra.mxu0 %vm440_vm0, %v7593_v15 }
 0x20d   : > { %v5915_v9 = vrot.slane %v4281_v6, 4  ;;  %6299 = vst [vmem:[%s6995_s22 + $0x2f0] sm:$0xff] %v6043_v7 }
 0x20f   : > { %v6044_v10 = vsel %vm5948_vm1, %v4261_v8, %v5915_v9 }
 0x210   : > { %6300 = vst [vmem:[%s6995_s22 + $0x2f8] sm:$0xff] %v6044_v10 }
 0x211   : > { %v4321_v11 = vpop.f32.mrf.mxu1  ;;  %v4301_v12 = vpop.f32.mrf.mxu0 }
 0x212   : > { %v5916_v13 = vrot.slane %v4321_v11, 4 }
 0x214   : > { %v4361_v14 = vpop.f32.mrf.mxu3  ;;  %v6045_v50 = vsel %vm5948_vm1, %v4301_v12, %v5916_v13  ;;  %v4341_v16 = vpop.f32.mrf.mxu2 }
 0x215   : > { %v5917_v17 = vrot.slane %v4361_v14, 4  ;;  %6301 = vst [vmem:[%s6995_s22 + $0x300] sm:$0xff] %v6045_v50 }
 0x217   : > { %v6046_v18 = vsel %vm5948_vm1, %v4341_v16, %v5917_v17 }
 0x218   : > { %6302 = vst [vmem:[%s6995_s22 + $0x308] sm:$0xff] %v6046_v18 }
 0x219   : > { %v4401_v15 = vpop.f32.mrf.mxu1  ;;  %v4381_v19 = vpop.f32.mrf.mxu0 }
 0x21a   : > { %v5918_v20 = vrot.slane %v4401_v15, 4 }
 0x21c   : > { %v4441_v21 = vpop.f32.mrf.mxu3  ;;  %v6047_v22 = vsel %vm5948_vm1, %v4381_v19, %v5918_v20  ;;  %v4421_v23 = vpop.f32.mrf.mxu2 }
 0x21d   : > { %v5919_v24 = vrot.slane %v4441_v21, 4  ;;  %6303 = vst [vmem:[%s6995_s22 + $0x310] sm:$0xff] %v6047_v22 }
 0x21f   : > { %v6048_v25 = vsel %vm5948_vm1, %v4421_v23, %v5919_v24 }
 0x220   : > { %6304 = vst [vmem:[%s6995_s22 + $0x318] sm:$0xff] %v6048_v25 }
 0x221   : > { %v4481_v26 = vpop.f32.mrf.mxu1  ;;  %v4461_v27 = vpop.f32.mrf.mxu0 }
 0x222   : > { %v5920_v28 = vrot.slane %v4481_v26, 4 }
 0x224   : > { %v4521_v29 = vpop.f32.mrf.mxu3  ;;  %v6049_v30 = vsel %vm5948_vm1, %v4461_v27, %v5920_v28  ;;  %v4501_v31 = vpop.f32.mrf.mxu2 }
 0x225   : > { %v5921_v32 = vrot.slane %v4521_v29, 4  ;;  %6305 = vst [vmem:[%s6995_s22 + $0x320] sm:$0xff] %v6049_v30 }
 0x227   : > { %v6050_v33 = vsel %vm5948_vm1, %v4501_v31, %v5921_v32 }
 0x228   : > { %6306 = vst [vmem:[%s6995_s22 + $0x328] sm:$0xff] %v6050_v33 }
 0x229   : > { %v4561_v34 = vpop.f32.mrf.mxu1  ;;  %v4541_v35 = vpop.f32.mrf.mxu0 }
 0x22a   : > { %v5922_v36 = vrot.slane %v4561_v34, 4 }
 0x22c   : > { %v4601_v37 = vpop.f32.mrf.mxu3  ;;  %v6051_v38 = vsel %vm5948_vm1, %v4541_v35, %v5922_v36  ;;  %v4581_v39 = vpop.f32.mrf.mxu2 }
 0x22d   : > { %v5923_v40 = vrot.slane %v4601_v37, 4  ;;  %6307 = vst [vmem:[%s6995_s22 + $0x330] sm:$0xff] %v6051_v38 }
 0x22f   : > { %v6052_v41 = vsel %vm5948_vm1, %v4581_v39, %v5923_v40 }
 0x230   : > { %6308 = vst [vmem:[%s6995_s22 + $0x338] sm:$0xff] %v6052_v41 }
 0x231   : > { %v4641_v42 = vpop.f32.mrf.mxu1  ;;  %v4621_v43 = vpop.f32.mrf.mxu0 }
 0x232   : > { %v5924_v44 = vrot.slane %v4641_v42, 4 }
 0x234   : > { %v4681_v45 = vpop.f32.mrf.mxu3  ;;  %v6053_v46 = vsel %vm5948_vm1, %v4621_v43, %v5924_v44  ;;  %v4661_v47 = vpop.f32.mrf.mxu2 }
 0x235   : > { %v5925_v48 = vrot.slane %v4681_v45, 4  ;;  %6309 = vst [vmem:[%s6995_s22 + $0x340] sm:$0xff] %v6053_v46 }
 0x237   : > { %v6054_v49 = vsel %vm5948_vm1, %v4661_v47, %v5925_v48 }
 0x238   : > { %6310 = vst [vmem:[%s6995_s22 + $0x348] sm:$0xff] %v6054_v49 }
 0x239   : > { %v4721_v0 = vpop.f32.mrf.mxu1  ;;  %v4701_v51 = vpop.f32.mrf.mxu0 }
 0x23a   : > { %v5926_v52 = vrot.slane %v4721_v0, 4 }
 0x23c   : > { %v4761_v53 = vpop.f32.mrf.mxu3  ;;  %v6055_v54 = vsel %vm5948_vm1, %v4701_v51, %v5926_v52  ;;  %v4741_v55 = vpop.f32.mrf.mxu2 }
 0x23d   : > { %v5927_v56 = vrot.slane %v4761_v53, 4  ;;  %6311 = vst [vmem:[%s6995_s22 + $0x350] sm:$0xff] %v6055_v54 }
 0x23f   : > { %v6056_v57 = vsel %vm5948_vm1, %v4741_v55, %v5927_v56 }
 0x240   : > { %6312 = vst [vmem:[%s6995_s22 + $0x358] sm:$0xff] %v6056_v57 }
 0x241   : > { %v4801_v58 = vpop.f32.mrf.mxu1  ;;  %v4781_v59 = vpop.f32.mrf.mxu0 }
 0x242   : > { %v5928_v60 = vrot.slane %v4801_v58, 4 }
 0x244   : > { %v4841_v61 = vpop.f32.mrf.mxu3  ;;  %v6057_v62 = vsel %vm5948_vm1, %v4781_v59, %v5928_v60  ;;  %v4821_v63 = vpop.f32.mrf.mxu2 }
 0x245   : > { %v5929_v1 = vrot.slane %v4841_v61, 4  ;;  %6313 = vst [vmem:[%s6995_s22 + $0x360] sm:$0xff] %v6057_v62 }
 0x247   : > { %v6058_v2 = vsel %vm5948_vm1, %v4821_v63, %v5929_v1 }
 0x248   : > { %6314 = vst [vmem:[%s6995_s22 + $0x368] sm:$0xff] %v6058_v2 }
 0x249   : > { %v4881_v3 = vpop.f32.mrf.mxu1  ;;  %v4861_v4 = vpop.f32.mrf.mxu0 }
 0x24a   : > { %v5930_v5 = vrot.slane %v4881_v3, 4 }
 0x24c   : > { %v4921_v6 = vpop.f32.mrf.mxu3  ;;  %v6059_v7 = vsel %vm5948_vm1, %v4861_v4, %v5930_v5  ;;  %v4901_v8 = vpop.f32.mrf.mxu2 }
 0x24d   : > { %v5931_v9 = vrot.slane %v4921_v6, 4  ;;  %6315 = vst [vmem:[%s6995_s22 + $0x370] sm:$0xff] %v6059_v7 }
 0x24f   : > { %v6060_v10 = vsel %vm5948_vm1, %v4901_v8, %v5931_v9 }
 0x250   : > { %6316 = vst [vmem:[%s6995_s22 + $0x378] sm:$0xff] %v6060_v10 }
 0x251   : > { %v4961_v11 = vpop.f32.mrf.mxu1  ;;  %v4941_v12 = vpop.f32.mrf.mxu0 }
 0x252   : > { %v5932_v13 = vrot.slane %v4961_v11, 4 }
 0x254   : > { %v5001_v14 = vpop.f32.mrf.mxu3  ;;  %v6061_v50 = vsel %vm5948_vm1, %v4941_v12, %v5932_v13  ;;  %v4981_v16 = vpop.f32.mrf.mxu2 }
 0x255   : > { %v5933_v17 = vrot.slane %v5001_v14, 4  ;;  %6317 = vst [vmem:[%s6995_s22 + $0x380] sm:$0xff] %v6061_v50 }
 0x257   : > { %v6062_v18 = vsel %vm5948_vm1, %v4981_v16, %v5933_v17 }
 0x258   : > { %6318 = vst [vmem:[%s6995_s22 + $0x388] sm:$0xff] %v6062_v18 }
 0x259   : > { %v5041_v15 = vpop.f32.mrf.mxu1  ;;  %v5021_v19 = vpop.f32.mrf.mxu0 }
 0x25a   : > { %v5934_v20 = vrot.slane %v5041_v15, 4 }
 0x25c   : > { %v5081_v21 = vpop.f32.mrf.mxu3  ;;  %v6063_v22 = vsel %vm5948_vm1, %v5021_v19, %v5934_v20  ;;  %v5061_v23 = vpop.f32.mrf.mxu2 }
 0x25d   : > { %v5935_v24 = vrot.slane %v5081_v21, 4  ;;  %6319 = vst [vmem:[%s6995_s22 + $0x390] sm:$0xff] %v6063_v22 }
 0x25f   : > { %v6064_v25 = vsel %vm5948_vm1, %v5061_v23, %v5935_v24 }
 0x260   : > { %6320 = vst [vmem:[%s6995_s22 + $0x398] sm:$0xff] %v6064_v25 }
 0x261   : > { %v5121_v26 = vpop.f32.mrf.mxu1  ;;  %v5101_v27 = vpop.f32.mrf.mxu0 }
 0x262   : > { %v5936_v28 = vrot.slane %v5121_v26, 4 }
 0x264   : > { %v5161_v29 = vpop.f32.mrf.mxu3  ;;  %v6065_v30 = vsel %vm5948_vm1, %v5101_v27, %v5936_v28  ;;  %v5141_v31 = vpop.f32.mrf.mxu2 }
 0x265   : > { %v5937_v32 = vrot.slane %v5161_v29, 4  ;;  %6321 = vst [vmem:[%s6995_s22 + $0x3a0] sm:$0xff] %v6065_v30 }
 0x267   : > { %v6066_v33 = vsel %vm5948_vm1, %v5141_v31, %v5937_v32 }
 0x268   : > { %6322 = vst [vmem:[%s6995_s22 + $0x3a8] sm:$0xff] %v6066_v33 }
 0x269   : > { %v5201_v34 = vpop.f32.mrf.mxu1  ;;  %v5181_v35 = vpop.f32.mrf.mxu0 }
 0x26a   : > { %v5938_v36 = vrot.slane %v5201_v34, 4 }
 0x26c   : > { %v5241_v37 = vpop.f32.mrf.mxu3  ;;  %v6067_v38 = vsel %vm5948_vm1, %v5181_v35, %v5938_v36  ;;  %v5221_v39 = vpop.f32.mrf.mxu2 }
 0x26d   : > { %v5939_v40 = vrot.slane %v5241_v37, 4  ;;  %6323 = vst [vmem:[%s6995_s22 + $0x3b0] sm:$0xff] %v6067_v38 }
 0x26f   : > { %v6068_v41 = vsel %vm5948_vm1, %v5221_v39, %v5939_v40 }
 0x270   : > { %6324 = vst [vmem:[%s6995_s22 + $0x3b8] sm:$0xff] %v6068_v41 }
 0x271   : > { %v5281_v42 = vpop.f32.mrf.mxu1  ;;  %v5261_v43 = vpop.f32.mrf.mxu0 }
 0x272   : > { %v5940_v44 = vrot.slane %v5281_v42, 4 }
 0x274   : > { %v5321_v45 = vpop.f32.mrf.mxu3  ;;  %v6069_v46 = vsel %vm5948_vm1, %v5261_v43, %v5940_v44  ;;  %v5301_v47 = vpop.f32.mrf.mxu2 }
 0x275   : > { %v5941_v48 = vrot.slane %v5321_v45, 4  ;;  %6325 = vst [vmem:[%s6995_s22 + $0x3c0] sm:$0xff] %v6069_v46 }
 0x277   : > { %v6070_v49 = vsel %vm5948_vm1, %v5301_v47, %v5941_v48 }
 0x278   : > { %6326 = vst [vmem:[%s6995_s22 + $0x3c8] sm:$0xff] %v6070_v49 }
 0x279   : > { %v5361_v0 = vpop.f32.mrf.mxu1  ;;  %v5341_v51 = vpop.f32.mrf.mxu0 }
 0x27a   : > { %v5942_v52 = vrot.slane %v5361_v0, 4 }
 0x27c   : > { %v5401_v53 = vpop.f32.mrf.mxu3  ;;  %v6071_v54 = vsel %vm5948_vm1, %v5341_v51, %v5942_v52  ;;  %v5381_v55 = vpop.f32.mrf.mxu2 }
 0x27d   : > { %v5943_v56 = vrot.slane %v5401_v53, 4  ;;  %6327 = vst [vmem:[%s6995_s22 + $0x3d0] sm:$0xff] %v6071_v54 }
 0x27f   : > { %v6072_v57 = vsel %vm5948_vm1, %v5381_v55, %v5943_v56 }
 0x280   : > { %6328 = vst [vmem:[%s6995_s22 + $0x3d8] sm:$0xff] %v6072_v57 }
 0x281   : > { %v5441_v58 = vpop.f32.mrf.mxu1  ;;  %v5421_v59 = vpop.f32.mrf.mxu0 }
 0x282   : > { %v5944_v60 = vrot.slane %v5441_v58, 4 }
 0x284   : > { %v5481_v61 = vpop.f32.mrf.mxu3  ;;  %v6073_v62 = vsel %vm5948_vm1, %v5421_v59, %v5944_v60  ;;  %v5461_v63 = vpop.f32.mrf.mxu2 }
 0x285   : > { %v5945_v1 = vrot.slane %v5481_v61, 4  ;;  %6329 = vst [vmem:[%s6995_s22 + $0x3e0] sm:$0xff] %v6073_v62 }
 0x287   : > { %v6074_v2 = vsel %vm5948_vm1, %v5461_v63, %v5945_v1 }
 0x288   : > { %6330 = vst [vmem:[%s6995_s22 + $0x3e8] sm:$0xff] %v6074_v2 }
 0x289   : > { %v5521_v3 = vpop.f32.mrf.mxu1  ;;  %v5501_v4 = vpop.f32.mrf.mxu0 }
 0x28a   : > { %v5946_v5 = vrot.slane %v5521_v3, 4 }
 0x28c   : > { %v5561_v6 = vpop.f32.mrf.mxu3  ;;  %v6075_v7 = vsel %vm5948_vm1, %v5501_v4, %v5946_v5  ;;  %v5541_v8 = vpop.f32.mrf.mxu2 }
 0x28d   : > { %v5947_v9 = vrot.slane %v5561_v6, 4  ;;  %6331 = vst [vmem:[%s6995_s22 + $0x3f0] sm:$0xff] %v6075_v7 }
 0x28f   : > { %v6076_v10 = vsel %vm5948_vm1, %v5541_v8, %v5947_v9 }
 0x290   : > { %6332 = vst [vmem:[%s6995_s22 + $0x3f8] sm:$0xff] %v6076_v10 }
 0x291 PF: > { %s12_s11 = sadd.s32 1, %s6737_s11   ;;  %s7837_s9 = smov %s6733_s10 }
 0x292   : > { %p9_p5 = scmp.ge.s32.totalorder %s12_s11, 4   ;;  %s7838_s10 = smov %s7840_s12 }
 0x294   :  { %11 = sbr.rel (!%p9_p5) target bundleno = 2 (0x2), region = 58 }

</bundles_post_ra>
